<compile_context>
chip_gen: v7x
topology: tpu7x:2x2x1
jax: 0.10.0
libtpu: 0.0.40
codegen_flags: <defaults>
</compile_context>

<pallas_src>
import functools

import jax
import jax.numpy as jnp
from jax import lax
from jax.experimental import pallas as pl
from jax.experimental.pallas import tpu as pltpu

FILTER_SIZE = 15
N_ORIENTATIONS = 8
N_CURVES = 2               # layer_size = 8 orientations * 2 curvatures = 16 filters
IN_CHANNELS = 3


def make_curvature_filters(dtype=jnp.float32):
    """Deterministic synthetic curvature wavelet filter bank.

    Returns weight of shape [C_out, C_in, 15, 15] (PyTorch OIHW conv layout).
    """
    fs = FILTER_SIZE
    half = (fs - 1) / 2.0
    coords = jnp.arange(fs, dtype=jnp.float32) - half
    yy, xx = jnp.meshgrid(coords, coords, indexing="ij")

    curves = [0.0, 0.08]
    sigma = 4.0
    freq = 1.0 / 6.0

    filters = []
    for o in range(N_ORIENTATIONS):
        th = o * jnp.pi / N_ORIENTATIONS
        xr = xx * jnp.cos(th) + yy * jnp.sin(th)
        yr = -xx * jnp.sin(th) + yy * jnp.cos(th)
        env = jnp.exp(-(xx ** 2 + yy ** 2) / (2.0 * sigma ** 2))
        for c in range(N_CURVES):
            carrier = jnp.cos(2.0 * jnp.pi * freq * (xr + curves[c] * yr ** 2))
            f = env * carrier
            f = f - jnp.mean(f)
            f = f / (jnp.sqrt(jnp.sum(f ** 2)) + 1e-6)
            filters.append(f)
    bank = jnp.stack(filters, axis=0)                                  # [C_out, 15, 15]
    # Same spatial filter applied to every input channel (grayscale-style average).
    w = jnp.broadcast_to(bank[:, None, :, :],
                         (bank.shape[0], IN_CHANNELS, fs, fs)) / float(IN_CHANNELS)
    return w.astype(dtype)


def _round_up(x, m):
    return ((x + m - 1) // m) * m


def _vmem_capacity_bytes():
    """Generation-aware VMEM capacity (conservative v7x-sized fallback)."""
    try:
        info = pltpu.get_tpu_info()
        cap = int(getattr(info, "vmem_capacity_bytes", 0) or 0)
        if cap > 0:
            return cap
    except Exception:
        pass
    return 64 * 1024 * 1024


def _pick_band_rows(H2, W, K, fs):
    """Pooled rows per band: largest divisor of H2 whose input band (which Pallas
    double-buffers) fits a generation-aware per-buffer VMEM budget."""
    budget = min(_vmem_capacity_bytes() // 10, 8 * 1024 * 1024)
    lane_w = _round_up(W, 128)
    sub_k = _round_up(K, 8)
    best = 1
    for cand in range(1, min(H2, 256) + 1):
        if H2 % cand:
            continue
        band_bytes = (2 * cand + fs - 1) * sub_k * lane_w * 4
        if band_bytes <= budget:
            best = cand
    return best


def _wavelet_band_kernel(band_ref, wt_ref, out_ref, *, bh2, fs, W, W2, C_out):
    """One (image, row-band) grid step.

    band_ref: [BH, fs*C, W]   row patches (K on sublanes, output column on lanes;
                              columns parity-packed: even | odd)
    wt_ref:   [fs, C_out, fs*C]
    out_ref:  [bh2, C_out, W2]  pooled output rows for this band
    """

    def conv_row(r):  # conv output row r within the band -> [C_out, W] f32
        acc = jnp.zeros((C_out, W), jnp.float32)
        for dy in range(fs):                       # 15 accumulating GEMMs, K = fs*C
            acc = acc + jnp.dot(wt_ref[dy], band_ref[r + dy],
                                preferred_element_type=jnp.float32)
        return acc

    def body(r2, carry):
        a = conv_row(2 * r2)
        b = conv_row(2 * r2 + 1)
        m = jnp.maximum(a, b)                      # max-pool over the 2 conv rows
        m = jnp.maximum(m[:, :W2], m[:, W2:])      # max-pool over the 2 column parities
        m = jnp.maximum(m, 0.0)                    # ReLU (commutes with max-pool)
        out_ref[r2] = m.astype(out_ref.dtype)
        return carry

    lax.fori_loop(0, bh2, body, 0)


def wavelet_layers_forward(x_nchw, weight):
    """WaveletLayers.forward: conv(15x15, pad=7) -> ReLU -> MaxPool2d(2). NCHW in/out."""
    N, C, H, W = x_nchw.shape
    C_out, wc, fs, fs2 = weight.shape
    assert wc == C and fs == fs2 and fs % 2 == 1
    # TODO(synk): odd H/W (PyTorch MaxPool2d floor semantics) needs pad+mask handling.
    assert H % 2 == 0 and W % 2 == 0, "even spatial dims required for 2x2 max-pool"
    pad = fs // 2
    H2, W2 = H // 2, W // 2
    K = fs * C

    xp = jnp.pad(x_nchw, ((0, 0), (0, 0), (pad, pad), (pad, pad)))     # [N, C, Hp, Wp]
    Hp = H + 2 * pad

    # Line-buffer row patches with column-parity packing:
    #   rp[n, h, dx*C + c, j] = xp[n, c, h, col(j) + dx]
    #   col(j) = 2*j           for j <  W2  (even output columns)
    #            2*(j-W2) + 1  for j >= W2  (odd output columns)
    slabs = []
    for dx in range(fs):
        ev = xp[:, :, :, dx:dx + W:2]                    # [N, C, Hp, W2]
        od = xp[:, :, :, dx + 1:dx + W:2]                # [N, C, Hp, W2]
        slabs.append(jnp.concatenate([ev, od], axis=-1))  # [N, C, Hp, W]
    rp = jnp.stack(slabs, axis=1)                        # [N, fs, C, Hp, W]
    rp = jnp.transpose(rp, (0, 3, 1, 2, 4)).reshape(N, Hp, K, W)

    # Overlapping row bands (14-row halo) so plain Blocked BlockSpecs suffice.
    bh2 = _pick_band_rows(H2, W, K, fs)                  # pooled rows per band
    NB = H2 // bh2
    BH = 2 * bh2 + (fs - 1)
    bands = jnp.stack([rp[:, 2 * bh2 * b:2 * bh2 * b + BH] for b in range(NB)],
                      axis=1)                            # [N, NB, BH, K, W]

    # Weight matched to the (dx, c) ordering of rp's K axis: wt[dy, o, dx*C + c].
    wt = jnp.transpose(weight, (2, 0, 3, 1)).reshape(fs, C_out, K)

    # VMEM sizing (band/out blocks are double-buffered by the pipeline).
    band_bytes = BH * _round_up(K, 8) * _round_up(W, 128) * 4
    out_bytes = bh2 * _round_up(C_out, 8) * _round_up(W2, 128) * 4
    wt_bytes = fs * _round_up(C_out, 8) * _round_up(K, 128) * 4
    vmem_limit = int(min(4 * (band_bytes + out_bytes + wt_bytes) + (16 << 20),
                         64 << 20))

    kernel = functools.partial(_wavelet_band_kernel, bh2=bh2, fs=fs, W=W, W2=W2,
                               C_out=C_out)
    out = pl.pallas_call(
        kernel,
        out_shape=jax.ShapeDtypeStruct((N, H2, C_out, W2), x_nchw.dtype),
        grid_spec=pltpu.PrefetchScalarGridSpec(
            num_scalar_prefetch=0,
            grid=(N, NB),
            in_specs=[
                pl.BlockSpec((None, None, BH, K, W), lambda n, b: (n, b, 0, 0, 0)),
                pl.BlockSpec((fs, C_out, K), lambda n, b: (0, 0, 0)),
            ],
            out_specs=pl.BlockSpec((None, bh2, C_out, W2),
                                   lambda n, b: (n, b, 0, 0)),
        ),
        compiler_params=pltpu.CompilerParams(
            dimension_semantics=("parallel", "parallel"),
            vmem_limit_bytes=vmem_limit),
    )(bands, wt)

    return jnp.transpose(out, (0, 2, 1, 3))              # [N, C_out, H2, W2]


def reference_forward(x_nchw, weight):
    """Pure-JAX reference of the PyTorch forward (conv -> relu -> maxpool2)."""
    pad = weight.shape[-1] // 2
    y = lax.conv_general_dilated(
        x_nchw, weight, window_strides=(1, 1),
        padding=[(pad, pad), (pad, pad)],
        dimension_numbers=("NCHW", "OIHW", "NCHW"))
    y = jnp.maximum(y, 0.0)
    y = lax.reduce_window(y, -jnp.inf, lax.max,
                          (1, 1, 2, 2), (1, 1, 2, 2), "VALID")
    return y


if __name__ == "__main__":
    key = jax.random.PRNGKey(0)
    x = jax.random.normal(key, (2, IN_CHANNELS, 16, 16), dtype=jnp.float32)
    weight = make_curvature_filters()

    fwd = jax.jit(wavelet_layers_forward)
    out = jax.block_until_ready(fwd(x, weight))

    ref = reference_forward(x, weight)
    assert out.shape == (2, N_ORIENTATIONS * N_CURVES, 8, 8), out.shape
    err = float(jnp.max(jnp.abs(out - ref)))
    assert err < 2e-3, err
    print("KERNEL_OK")
</pallas_src>

<mosaic_0001>
module attributes {stable_mosaic.version = 11 : i64} {
  func.func @_wavelet_band_kernel(%arg0: i32, %arg1: i32, %arg2: memref<1x1x30x45x16xf32, #tpu.memory_space<vmem>>, %arg3: memref<15x16x45xf32, #tpu.memory_space<vmem>>, %arg4: memref<1x8x16x8xf32, #tpu.memory_space<vmem>>) attributes {dimension_semantics = [#tpu.dimension_semantics<parallel>, #tpu.dimension_semantics<parallel>], iteration_bounds = array<i64: 2, 1>, scalar_prefetch = 0 : i64, scratch_operands = 0 : i64, tpu.core_type = #tpu.core_type<tc>, window_params = [{transform_indices = @transform_0, window_bounds = array<i64: 1, 1, 30, 45, 16>}, {pipeline_mode = #tpu.pipeline_mode<synchronous>, transform_indices = @transform_1, window_bounds = array<i64: 15, 16, 45>}, {transform_indices = @transform_2, window_bounds = array<i64: 1, 8, 16, 8>}]} {
    %c0_i32 = arith.constant 0 : i32
    %c8_i32 = arith.constant 8 : i32
    %0 = arith.addi %c0_i32, %c8_i32 : i32
    %c1_i32 = arith.constant 1 : i32
    scf.for %arg5 = %c0_i32 to %0 step %c1_i32  : i32 {
      %c2_i32 = arith.constant 2 : i32
      %1 = arith.muli %c2_i32, %arg5 : i32
      %cst = arith.constant 0.000000e+00 : f32
      %2 = vector.broadcast %cst : f32 to vector<16x16xf32>
      %c0 = arith.constant 0 : index
      %c0_1 = arith.constant 0 : index
      %c0_2 = arith.constant 0 : index
      %3 = vector.load %arg3[%c0, %c0_1, %c0_2] : memref<15x16x45xf32, #tpu.memory_space<vmem>>, vector<1x16x45xf32>
      %4 = vector.shape_cast %3 : vector<1x16x45xf32> to vector<16x45xf32>
      %c0_i32_3 = arith.constant 0 : i32
      %5 = arith.addi %1, %c0_i32_3 : i32
      %c0_4 = arith.constant 0 : index
      %c0_5 = arith.constant 0 : index
      %6 = arith.index_cast %5 : i32 to index
      %c0_6 = arith.constant 0 : index
      %c0_7 = arith.constant 0 : index
      %7 = vector.load %arg2[%c0_4, %c0_5, %6, %c0_6, %c0_7] : memref<1x1x30x45x16xf32, #tpu.memory_space<vmem>>, vector<1x1x1x45x16xf32>
      %8 = vector.shape_cast %7 : vector<1x1x1x45x16xf32> to vector<45x16xf32>
      %cst_8 = arith.constant dense<0.000000e+00> : vector<16x16xf32>
      %9 = tpu.matmul %4, %8, %cst_8 {dimension_numbers = #tpu.dot_dimension_numbers<[1], [0], [0], [1], [0, 0, 1, 1], [], []>} : vector<16x45xf32>, vector<45x16xf32>, vector<16x16xf32> -> vector<16x16xf32>
      %10 = arith.addf %2, %9 : vector<16x16xf32>
      %c1 = arith.constant 1 : index
      %c0_9 = arith.constant 0 : index
      %c0_10 = arith.constant 0 : index
      %11 = vector.load %arg3[%c1, %c0_9, %c0_10] : memref<15x16x45xf32, #tpu.memory_space<vmem>>, vector<1x16x45xf32>
      %12 = vector.shape_cast %11 : vector<1x16x45xf32> to vector<16x45xf32>
      %c1_i32_11 = arith.constant 1 : i32
      %13 = arith.addi %1, %c1_i32_11 : i32
      %c0_12 = arith.constant 0 : index
      %c0_13 = arith.constant 0 : index
      %14 = arith.index_cast %13 : i32 to index
      %c0_14 = arith.constant 0 : index
      %c0_15 = arith.constant 0 : index
      %15 = vector.load %arg2[%c0_12, %c0_13, %14, %c0_14, %c0_15] : memref<1x1x30x45x16xf32, #tpu.memory_space<vmem>>, vector<1x1x1x45x16xf32>
      %16 = vector.shape_cast %15 : vector<1x1x1x45x16xf32> to vector<45x16xf32>
      %cst_16 = arith.constant dense<0.000000e+00> : vector<16x16xf32>
      %17 = tpu.matmul %12, %16, %cst_16 {dimension_numbers = #tpu.dot_dimension_numbers<[1], [0], [0], [1], [0, 0, 1, 1], [], []>} : vector<16x45xf32>, vector<45x16xf32>, vector<16x16xf32> -> vector<16x16xf32>
      %18 = arith.addf %10, %17 : vector<16x16xf32>
      %c2 = arith.constant 2 : index
      %c0_17 = arith.constant 0 : index
      %c0_18 = arith.constant 0 : index
      %19 = vector.load %arg3[%c2, %c0_17, %c0_18] : memref<15x16x45xf32, #tpu.memory_space<vmem>>, vector<1x16x45xf32>
      %20 = vector.shape_cast %19 : vector<1x16x45xf32> to vector<16x45xf32>
      %c2_i32_19 = arith.constant 2 : i32
      %21 = arith.addi %1, %c2_i32_19 : i32
      %c0_20 = arith.constant 0 : index
      %c0_21 = arith.constant 0 : index
      %22 = arith.index_cast %21 : i32 to index
      %c0_22 = arith.constant 0 : index
      %c0_23 = arith.constant 0 : index
      %23 = vector.load %arg2[%c0_20, %c0_21, %22, %c0_22, %c0_23] : memref<1x1x30x45x16xf32, #tpu.memory_space<vmem>>, vector<1x1x1x45x16xf32>
      %24 = vector.shape_cast %23 : vector<1x1x1x45x16xf32> to vector<45x16xf32>
      %cst_24 = arith.constant dense<0.000000e+00> : vector<16x16xf32>
      %25 = tpu.matmul %20, %24, %cst_24 {dimension_numbers = #tpu.dot_dimension_numbers<[1], [0], [0], [1], [0, 0, 1, 1], [], []>} : vector<16x45xf32>, vector<45x16xf32>, vector<16x16xf32> -> vector<16x16xf32>
      %26 = arith.addf %18, %25 : vector<16x16xf32>
      %c3 = arith.constant 3 : index
      %c0_25 = arith.constant 0 : index
      %c0_26 = arith.constant 0 : index
      %27 = vector.load %arg3[%c3, %c0_25, %c0_26] : memref<15x16x45xf32, #tpu.memory_space<vmem>>, vector<1x16x45xf32>
      %28 = vector.shape_cast %27 : vector<1x16x45xf32> to vector<16x45xf32>
      %c3_i32 = arith.constant 3 : i32
      %29 = arith.addi %1, %c3_i32 : i32
      %c0_27 = arith.constant 0 : index
      %c0_28 = arith.constant 0 : index
      %30 = arith.index_cast %29 : i32 to index
      %c0_29 = arith.constant 0 : index
      %c0_30 = arith.constant 0 : index
      %31 = vector.load %arg2[%c0_27, %c0_28, %30, %c0_29, %c0_30] : memref<1x1x30x45x16xf32, #tpu.memory_space<vmem>>, vector<1x1x1x45x16xf32>
      %32 = vector.shape_cast %31 : vector<1x1x1x45x16xf32> to vector<45x16xf32>
      %cst_31 = arith.constant dense<0.000000e+00> : vector<16x16xf32>
      %33 = tpu.matmul %28, %32, %cst_31 {dimension_numbers = #tpu.dot_dimension_numbers<[1], [0], [0], [1], [0, 0, 1, 1], [], []>} : vector<16x45xf32>, vector<45x16xf32>, vector<16x16xf32> -> vector<16x16xf32>
      %34 = arith.addf %26, %33 : vector<16x16xf32>
      %c4 = arith.constant 4 : index
      %c0_32 = arith.constant 0 : index
      %c0_33 = arith.constant 0 : index
      %35 = vector.load %arg3[%c4, %c0_32, %c0_33] : memref<15x16x45xf32, #tpu.memory_space<vmem>>, vector<1x16x45xf32>
      %36 = vector.shape_cast %35 : vector<1x16x45xf32> to vector<16x45xf32>
      %c4_i32 = arith.constant 4 : i32
      %37 = arith.addi %1, %c4_i32 : i32
      %c0_34 = arith.constant 0 : index
      %c0_35 = arith.constant 0 : index
      %38 = arith.index_cast %37 : i32 to index
      %c0_36 = arith.constant 0 : index
      %c0_37 = arith.constant 0 : index
      %39 = vector.load %arg2[%c0_34, %c0_35, %38, %c0_36, %c0_37] : memref<1x1x30x45x16xf32, #tpu.memory_space<vmem>>, vector<1x1x1x45x16xf32>
      %40 = vector.shape_cast %39 : vector<1x1x1x45x16xf32> to vector<45x16xf32>
      %cst_38 = arith.constant dense<0.000000e+00> : vector<16x16xf32>
      %41 = tpu.matmul %36, %40, %cst_38 {dimension_numbers = #tpu.dot_dimension_numbers<[1], [0], [0], [1], [0, 0, 1, 1], [], []>} : vector<16x45xf32>, vector<45x16xf32>, vector<16x16xf32> -> vector<16x16xf32>
      %42 = arith.addf %34, %41 : vector<16x16xf32>
      %c5 = arith.constant 5 : index
      %c0_39 = arith.constant 0 : index
      %c0_40 = arith.constant 0 : index
      %43 = vector.load %arg3[%c5, %c0_39, %c0_40] : memref<15x16x45xf32, #tpu.memory_space<vmem>>, vector<1x16x45xf32>
      %44 = vector.shape_cast %43 : vector<1x16x45xf32> to vector<16x45xf32>
      %c5_i32 = arith.constant 5 : i32
      %45 = arith.addi %1, %c5_i32 : i32
      %c0_41 = arith.constant 0 : index
      %c0_42 = arith.constant 0 : index
      %46 = arith.index_cast %45 : i32 to index
      %c0_43 = arith.constant 0 : index
      %c0_44 = arith.constant 0 : index
      %47 = vector.load %arg2[%c0_41, %c0_42, %46, %c0_43, %c0_44] : memref<1x1x30x45x16xf32, #tpu.memory_space<vmem>>, vector<1x1x1x45x16xf32>
      %48 = vector.shape_cast %47 : vector<1x1x1x45x16xf32> to vector<45x16xf32>
      %cst_45 = arith.constant dense<0.000000e+00> : vector<16x16xf32>
      %49 = tpu.matmul %44, %48, %cst_45 {dimension_numbers = #tpu.dot_dimension_numbers<[1], [0], [0], [1], [0, 0, 1, 1], [], []>} : vector<16x45xf32>, vector<45x16xf32>, vector<16x16xf32> -> vector<16x16xf32>
      %50 = arith.addf %42, %49 : vector<16x16xf32>
      %c6 = arith.constant 6 : index
      %c0_46 = arith.constant 0 : index
      %c0_47 = arith.constant 0 : index
      %51 = vector.load %arg3[%c6, %c0_46, %c0_47] : memref<15x16x45xf32, #tpu.memory_space<vmem>>, vector<1x16x45xf32>
      %52 = vector.shape_cast %51 : vector<1x16x45xf32> to vector<16x45xf32>
      %c6_i32 = arith.constant 6 : i32
      %53 = arith.addi %1, %c6_i32 : i32
      %c0_48 = arith.constant 0 : index
      %c0_49 = arith.constant 0 : index
      %54 = arith.index_cast %53 : i32 to index
      %c0_50 = arith.constant 0 : index
      %c0_51 = arith.constant 0 : index
      %55 = vector.load %arg2[%c0_48, %c0_49, %54, %c0_50, %c0_51] : memref<1x1x30x45x16xf32, #tpu.memory_space<vmem>>, vector<1x1x1x45x16xf32>
      %56 = vector.shape_cast %55 : vector<1x1x1x45x16xf32> to vector<45x16xf32>
      %cst_52 = arith.constant dense<0.000000e+00> : vector<16x16xf32>
      %57 = tpu.matmul %52, %56, %cst_52 {dimension_numbers = #tpu.dot_dimension_numbers<[1], [0], [0], [1], [0, 0, 1, 1], [], []>} : vector<16x45xf32>, vector<45x16xf32>, vector<16x16xf32> -> vector<16x16xf32>
      %58 = arith.addf %50, %57 : vector<16x16xf32>
      %c7 = arith.constant 7 : index
      %c0_53 = arith.constant 0 : index
      %c0_54 = arith.constant 0 : index
      %59 = vector.load %arg3[%c7, %c0_53, %c0_54] : memref<15x16x45xf32, #tpu.memory_space<vmem>>, vector<1x16x45xf32>
      %60 = vector.shape_cast %59 : vector<1x16x45xf32> to vector<16x45xf32>
      %c7_i32 = arith.constant 7 : i32
      %61 = arith.addi %1, %c7_i32 : i32
      %c0_55 = arith.constant 0 : index
      %c0_56 = arith.constant 0 : index
      %62 = arith.index_cast %61 : i32 to index
      %c0_57 = arith.constant 0 : index
      %c0_58 = arith.constant 0 : index
      %63 = vector.load %arg2[%c0_55, %c0_56, %62, %c0_57, %c0_58] : memref<1x1x30x45x16xf32, #tpu.memory_space<vmem>>, vector<1x1x1x45x16xf32>
      %64 = vector.shape_cast %63 : vector<1x1x1x45x16xf32> to vector<45x16xf32>
      %cst_59 = arith.constant dense<0.000000e+00> : vector<16x16xf32>
      %65 = tpu.matmul %60, %64, %cst_59 {dimension_numbers = #tpu.dot_dimension_numbers<[1], [0], [0], [1], [0, 0, 1, 1], [], []>} : vector<16x45xf32>, vector<45x16xf32>, vector<16x16xf32> -> vector<16x16xf32>
      %66 = arith.addf %58, %65 : vector<16x16xf32>
      %c8 = arith.constant 8 : index
      %c0_60 = arith.constant 0 : index
      %c0_61 = arith.constant 0 : index
      %67 = vector.load %arg3[%c8, %c0_60, %c0_61] : memref<15x16x45xf32, #tpu.memory_space<vmem>>, vector<1x16x45xf32>
      %68 = vector.shape_cast %67 : vector<1x16x45xf32> to vector<16x45xf32>
      %c8_i32_62 = arith.constant 8 : i32
      %69 = arith.addi %1, %c8_i32_62 : i32
      %c0_63 = arith.constant 0 : index
      %c0_64 = arith.constant 0 : index
      %70 = arith.index_cast %69 : i32 to index
      %c0_65 = arith.constant 0 : index
      %c0_66 = arith.constant 0 : index
      %71 = vector.load %arg2[%c0_63, %c0_64, %70, %c0_65, %c0_66] : memref<1x1x30x45x16xf32, #tpu.memory_space<vmem>>, vector<1x1x1x45x16xf32>
      %72 = vector.shape_cast %71 : vector<1x1x1x45x16xf32> to vector<45x16xf32>
      %cst_67 = arith.constant dense<0.000000e+00> : vector<16x16xf32>
      %73 = tpu.matmul %68, %72, %cst_67 {dimension_numbers = #tpu.dot_dimension_numbers<[1], [0], [0], [1], [0, 0, 1, 1], [], []>} : vector<16x45xf32>, vector<45x16xf32>, vector<16x16xf32> -> vector<16x16xf32>
      %74 = arith.addf %66, %73 : vector<16x16xf32>
      %c9 = arith.constant 9 : index
      %c0_68 = arith.constant 0 : index
      %c0_69 = arith.constant 0 : index
      %75 = vector.load %arg3[%c9, %c0_68, %c0_69] : memref<15x16x45xf32, #tpu.memory_space<vmem>>, vector<1x16x45xf32>
      %76 = vector.shape_cast %75 : vector<1x16x45xf32> to vector<16x45xf32>
      %c9_i32 = arith.constant 9 : i32
      %77 = arith.addi %1, %c9_i32 : i32
      %c0_70 = arith.constant 0 : index
      %c0_71 = arith.constant 0 : index
      %78 = arith.index_cast %77 : i32 to index
      %c0_72 = arith.constant 0 : index
      %c0_73 = arith.constant 0 : index
      %79 = vector.load %arg2[%c0_70, %c0_71, %78, %c0_72, %c0_73] : memref<1x1x30x45x16xf32, #tpu.memory_space<vmem>>, vector<1x1x1x45x16xf32>
      %80 = vector.shape_cast %79 : vector<1x1x1x45x16xf32> to vector<45x16xf32>
      %cst_74 = arith.constant dense<0.000000e+00> : vector<16x16xf32>
      %81 = tpu.matmul %76, %80, %cst_74 {dimension_numbers = #tpu.dot_dimension_numbers<[1], [0], [0], [1], [0, 0, 1, 1], [], []>} : vector<16x45xf32>, vector<45x16xf32>, vector<16x16xf32> -> vector<16x16xf32>
      %82 = arith.addf %74, %81 : vector<16x16xf32>
      %c10 = arith.constant 10 : index
      %c0_75 = arith.constant 0 : index
      %c0_76 = arith.constant 0 : index
      %83 = vector.load %arg3[%c10, %c0_75, %c0_76] : memref<15x16x45xf32, #tpu.memory_space<vmem>>, vector<1x16x45xf32>
      %84 = vector.shape_cast %83 : vector<1x16x45xf32> to vector<16x45xf32>
      %c10_i32 = arith.constant 10 : i32
      %85 = arith.addi %1, %c10_i32 : i32
      %c0_77 = arith.constant 0 : index
      %c0_78 = arith.constant 0 : index
      %86 = arith.index_cast %85 : i32 to index
      %c0_79 = arith.constant 0 : index
      %c0_80 = arith.constant 0 : index
      %87 = vector.load %arg2[%c0_77, %c0_78, %86, %c0_79, %c0_80] : memref<1x1x30x45x16xf32, #tpu.memory_space<vmem>>, vector<1x1x1x45x16xf32>
      %88 = vector.shape_cast %87 : vector<1x1x1x45x16xf32> to vector<45x16xf32>
      %cst_81 = arith.constant dense<0.000000e+00> : vector<16x16xf32>
      %89 = tpu.matmul %84, %88, %cst_81 {dimension_numbers = #tpu.dot_dimension_numbers<[1], [0], [0], [1], [0, 0, 1, 1], [], []>} : vector<16x45xf32>, vector<45x16xf32>, vector<16x16xf32> -> vector<16x16xf32>
      %90 = arith.addf %82, %89 : vector<16x16xf32>
      %c11 = arith.constant 11 : index
      %c0_82 = arith.constant 0 : index
      %c0_83 = arith.constant 0 : index
      %91 = vector.load %arg3[%c11, %c0_82, %c0_83] : memref<15x16x45xf32, #tpu.memory_space<vmem>>, vector<1x16x45xf32>
      %92 = vector.shape_cast %91 : vector<1x16x45xf32> to vector<16x45xf32>
      %c11_i32 = arith.constant 11 : i32
      %93 = arith.addi %1, %c11_i32 : i32
      %c0_84 = arith.constant 0 : index
      %c0_85 = arith.constant 0 : index
      %94 = arith.index_cast %93 : i32 to index
      %c0_86 = arith.constant 0 : index
      %c0_87 = arith.constant 0 : index
      %95 = vector.load %arg2[%c0_84, %c0_85, %94, %c0_86, %c0_87] : memref<1x1x30x45x16xf32, #tpu.memory_space<vmem>>, vector<1x1x1x45x16xf32>
      %96 = vector.shape_cast %95 : vector<1x1x1x45x16xf32> to vector<45x16xf32>
      %cst_88 = arith.constant dense<0.000000e+00> : vector<16x16xf32>
      %97 = tpu.matmul %92, %96, %cst_88 {dimension_numbers = #tpu.dot_dimension_numbers<[1], [0], [0], [1], [0, 0, 1, 1], [], []>} : vector<16x45xf32>, vector<45x16xf32>, vector<16x16xf32> -> vector<16x16xf32>
      %98 = arith.addf %90, %97 : vector<16x16xf32>
      %c12 = arith.constant 12 : index
      %c0_89 = arith.constant 0 : index
      %c0_90 = arith.constant 0 : index
      %99 = vector.load %arg3[%c12, %c0_89, %c0_90] : memref<15x16x45xf32, #tpu.memory_space<vmem>>, vector<1x16x45xf32>
      %100 = vector.shape_cast %99 : vector<1x16x45xf32> to vector<16x45xf32>
      %c12_i32 = arith.constant 12 : i32
      %101 = arith.addi %1, %c12_i32 : i32
      %c0_91 = arith.constant 0 : index
      %c0_92 = arith.constant 0 : index
      %102 = arith.index_cast %101 : i32 to index
      %c0_93 = arith.constant 0 : index
      %c0_94 = arith.constant 0 : index
      %103 = vector.load %arg2[%c0_91, %c0_92, %102, %c0_93, %c0_94] : memref<1x1x30x45x16xf32, #tpu.memory_space<vmem>>, vector<1x1x1x45x16xf32>
      %104 = vector.shape_cast %103 : vector<1x1x1x45x16xf32> to vector<45x16xf32>
      %cst_95 = arith.constant dense<0.000000e+00> : vector<16x16xf32>
      %105 = tpu.matmul %100, %104, %cst_95 {dimension_numbers = #tpu.dot_dimension_numbers<[1], [0], [0], [1], [0, 0, 1, 1], [], []>} : vector<16x45xf32>, vector<45x16xf32>, vector<16x16xf32> -> vector<16x16xf32>
      %106 = arith.addf %98, %105 : vector<16x16xf32>
      %c13 = arith.constant 13 : index
      %c0_96 = arith.constant 0 : index
      %c0_97 = arith.constant 0 : index
      %107 = vector.load %arg3[%c13, %c0_96, %c0_97] : memref<15x16x45xf32, #tpu.memory_space<vmem>>, vector<1x16x45xf32>
      %108 = vector.shape_cast %107 : vector<1x16x45xf32> to vector<16x45xf32>
      %c13_i32 = arith.constant 13 : i32
      %109 = arith.addi %1, %c13_i32 : i32
      %c0_98 = arith.constant 0 : index
      %c0_99 = arith.constant 0 : index
      %110 = arith.index_cast %109 : i32 to index
      %c0_100 = arith.constant 0 : index
      %c0_101 = arith.constant 0 : index
      %111 = vector.load %arg2[%c0_98, %c0_99, %110, %c0_100, %c0_101] : memref<1x1x30x45x16xf32, #tpu.memory_space<vmem>>, vector<1x1x1x45x16xf32>
      %112 = vector.shape_cast %111 : vector<1x1x1x45x16xf32> to vector<45x16xf32>
      %cst_102 = arith.constant dense<0.000000e+00> : vector<16x16xf32>
      %113 = tpu.matmul %108, %112, %cst_102 {dimension_numbers = #tpu.dot_dimension_numbers<[1], [0], [0], [1], [0, 0, 1, 1], [], []>} : vector<16x45xf32>, vector<45x16xf32>, vector<16x16xf32> -> vector<16x16xf32>
      %114 = arith.addf %106, %113 : vector<16x16xf32>
      %c14 = arith.constant 14 : index
      %c0_103 = arith.constant 0 : index
      %c0_104 = arith.constant 0 : index
      %115 = vector.load %arg3[%c14, %c0_103, %c0_104] : memref<15x16x45xf32, #tpu.memory_space<vmem>>, vector<1x16x45xf32>
      %116 = vector.shape_cast %115 : vector<1x16x45xf32> to vector<16x45xf32>
      %c14_i32 = arith.constant 14 : i32
      %117 = arith.addi %1, %c14_i32 : i32
      %c0_105 = arith.constant 0 : index
      %c0_106 = arith.constant 0 : index
      %118 = arith.index_cast %117 : i32 to index
      %c0_107 = arith.constant 0 : index
      %c0_108 = arith.constant 0 : index
      %119 = vector.load %arg2[%c0_105, %c0_106, %118, %c0_107, %c0_108] : memref<1x1x30x45x16xf32, #tpu.memory_space<vmem>>, vector<1x1x1x45x16xf32>
      %120 = vector.shape_cast %119 : vector<1x1x1x45x16xf32> to vector<45x16xf32>
      %cst_109 = arith.constant dense<0.000000e+00> : vector<16x16xf32>
      %121 = tpu.matmul %116, %120, %cst_109 {dimension_numbers = #tpu.dot_dimension_numbers<[1], [0], [0], [1], [0, 0, 1, 1], [], []>} : vector<16x45xf32>, vector<45x16xf32>, vector<16x16xf32> -> vector<16x16xf32>
      %122 = arith.addf %114, %121 : vector<16x16xf32>
      %c2_i32_110 = arith.constant 2 : i32
      %123 = arith.muli %c2_i32_110, %arg5 : i32
      %c1_i32_111 = arith.constant 1 : i32
      %124 = arith.addi %123, %c1_i32_111 : i32
      %cst_112 = arith.constant 0.000000e+00 : f32
      %125 = vector.broadcast %cst_112 : f32 to vector<16x16xf32>
      %c0_113 = arith.constant 0 : index
      %c0_114 = arith.constant 0 : index
      %c0_115 = arith.constant 0 : index
      %126 = vector.load %arg3[%c0_113, %c0_114, %c0_115] : memref<15x16x45xf32, #tpu.memory_space<vmem>>, vector<1x16x45xf32>
      %127 = vector.shape_cast %126 : vector<1x16x45xf32> to vector<16x45xf32>
      %c0_i32_116 = arith.constant 0 : i32
      %128 = arith.addi %124, %c0_i32_116 : i32
      %c0_117 = arith.constant 0 : index
      %c0_118 = arith.constant 0 : index
      %129 = arith.index_cast %128 : i32 to index
      %c0_119 = arith.constant 0 : index
      %c0_120 = arith.constant 0 : index
      %130 = vector.load %arg2[%c0_117, %c0_118, %129, %c0_119, %c0_120] : memref<1x1x30x45x16xf32, #tpu.memory_space<vmem>>, vector<1x1x1x45x16xf32>
      %131 = vector.shape_cast %130 : vector<1x1x1x45x16xf32> to vector<45x16xf32>
      %cst_121 = arith.constant dense<0.000000e+00> : vector<16x16xf32>
      %132 = tpu.matmul %127, %131, %cst_121 {dimension_numbers = #tpu.dot_dimension_numbers<[1], [0], [0], [1], [0, 0, 1, 1], [], []>} : vector<16x45xf32>, vector<45x16xf32>, vector<16x16xf32> -> vector<16x16xf32>
      %133 = arith.addf %125, %132 : vector<16x16xf32>
      %c1_122 = arith.constant 1 : index
      %c0_123 = arith.constant 0 : index
      %c0_124 = arith.constant 0 : index
      %134 = vector.load %arg3[%c1_122, %c0_123, %c0_124] : memref<15x16x45xf32, #tpu.memory_space<vmem>>, vector<1x16x45xf32>
      %135 = vector.shape_cast %134 : vector<1x16x45xf32> to vector<16x45xf32>
      %c1_i32_125 = arith.constant 1 : i32
      %136 = arith.addi %124, %c1_i32_125 : i32
      %c0_126 = arith.constant 0 : index
      %c0_127 = arith.constant 0 : index
      %137 = arith.index_cast %136 : i32 to index
      %c0_128 = arith.constant 0 : index
      %c0_129 = arith.constant 0 : index
      %138 = vector.load %arg2[%c0_126, %c0_127, %137, %c0_128, %c0_129] : memref<1x1x30x45x16xf32, #tpu.memory_space<vmem>>, vector<1x1x1x45x16xf32>
      %139 = vector.shape_cast %138 : vector<1x1x1x45x16xf32> to vector<45x16xf32>
      %cst_130 = arith.constant dense<0.000000e+00> : vector<16x16xf32>
      %140 = tpu.matmul %135, %139, %cst_130 {dimension_numbers = #tpu.dot_dimension_numbers<[1], [0], [0], [1], [0, 0, 1, 1], [], []>} : vector<16x45xf32>, vector<45x16xf32>, vector<16x16xf32> -> vector<16x16xf32>
      %141 = arith.addf %133, %140 : vector<16x16xf32>
      %c2_131 = arith.constant 2 : index
      %c0_132 = arith.constant 0 : index
      %c0_133 = arith.constant 0 : index
      %142 = vector.load %arg3[%c2_131, %c0_132, %c0_133] : memref<15x16x45xf32, #tpu.memory_space<vmem>>, vector<1x16x45xf32>
      %143 = vector.shape_cast %142 : vector<1x16x45xf32> to vector<16x45xf32>
      %c2_i32_134 = arith.constant 2 : i32
      %144 = arith.addi %124, %c2_i32_134 : i32
      %c0_135 = arith.constant 0 : index
      %c0_136 = arith.constant 0 : index
      %145 = arith.index_cast %144 : i32 to index
      %c0_137 = arith.constant 0 : index
      %c0_138 = arith.constant 0 : index
      %146 = vector.load %arg2[%c0_135, %c0_136, %145, %c0_137, %c0_138] : memref<1x1x30x45x16xf32, #tpu.memory_space<vmem>>, vector<1x1x1x45x16xf32>
      %147 = vector.shape_cast %146 : vector<1x1x1x45x16xf32> to vector<45x16xf32>
      %cst_139 = arith.constant dense<0.000000e+00> : vector<16x16xf32>
      %148 = tpu.matmul %143, %147, %cst_139 {dimension_numbers = #tpu.dot_dimension_numbers<[1], [0], [0], [1], [0, 0, 1, 1], [], []>} : vector<16x45xf32>, vector<45x16xf32>, vector<16x16xf32> -> vector<16x16xf32>
      %149 = arith.addf %141, %148 : vector<16x16xf32>
      %c3_140 = arith.constant 3 : index
      %c0_141 = arith.constant 0 : index
      %c0_142 = arith.constant 0 : index
      %150 = vector.load %arg3[%c3_140, %c0_141, %c0_142] : memref<15x16x45xf32, #tpu.memory_space<vmem>>, vector<1x16x45xf32>
      %151 = vector.shape_cast %150 : vector<1x16x45xf32> to vector<16x45xf32>
      %c3_i32_143 = arith.constant 3 : i32
      %152 = arith.addi %124, %c3_i32_143 : i32
      %c0_144 = arith.constant 0 : index
      %c0_145 = arith.constant 0 : index
      %153 = arith.index_cast %152 : i32 to index
      %c0_146 = arith.constant 0 : index
      %c0_147 = arith.constant 0 : index
      %154 = vector.load %arg2[%c0_144, %c0_145, %153, %c0_146, %c0_147] : memref<1x1x30x45x16xf32, #tpu.memory_space<vmem>>, vector<1x1x1x45x16xf32>
      %155 = vector.shape_cast %154 : vector<1x1x1x45x16xf32> to vector<45x16xf32>
      %cst_148 = arith.constant dense<0.000000e+00> : vector<16x16xf32>
      %156 = tpu.matmul %151, %155, %cst_148 {dimension_numbers = #tpu.dot_dimension_numbers<[1], [0], [0], [1], [0, 0, 1, 1], [], []>} : vector<16x45xf32>, vector<45x16xf32>, vector<16x16xf32> -> vector<16x16xf32>
      %157 = arith.addf %149, %156 : vector<16x16xf32>
      %c4_149 = arith.constant 4 : index
      %c0_150 = arith.constant 0 : index
      %c0_151 = arith.constant 0 : index
      %158 = vector.load %arg3[%c4_149, %c0_150, %c0_151] : memref<15x16x45xf32, #tpu.memory_space<vmem>>, vector<1x16x45xf32>
      %159 = vector.shape_cast %158 : vector<1x16x45xf32> to vector<16x45xf32>
      %c4_i32_152 = arith.constant 4 : i32
      %160 = arith.addi %124, %c4_i32_152 : i32
      %c0_153 = arith.constant 0 : index
      %c0_154 = arith.constant 0 : index
      %161 = arith.index_cast %160 : i32 to index
      %c0_155 = arith.constant 0 : index
      %c0_156 = arith.constant 0 : index
      %162 = vector.load %arg2[%c0_153, %c0_154, %161, %c0_155, %c0_156] : memref<1x1x30x45x16xf32, #tpu.memory_space<vmem>>, vector<1x1x1x45x16xf32>
      %163 = vector.shape_cast %162 : vector<1x1x1x45x16xf32> to vector<45x16xf32>
      %cst_157 = arith.constant dense<0.000000e+00> : vector<16x16xf32>
      %164 = tpu.matmul %159, %163, %cst_157 {dimension_numbers = #tpu.dot_dimension_numbers<[1], [0], [0], [1], [0, 0, 1, 1], [], []>} : vector<16x45xf32>, vector<45x16xf32>, vector<16x16xf32> -> vector<16x16xf32>
      %165 = arith.addf %157, %164 : vector<16x16xf32>
      %c5_158 = arith.constant 5 : index
      %c0_159 = arith.constant 0 : index
      %c0_160 = arith.constant 0 : index
      %166 = vector.load %arg3[%c5_158, %c0_159, %c0_160] : memref<15x16x45xf32, #tpu.memory_space<vmem>>, vector<1x16x45xf32>
      %167 = vector.shape_cast %166 : vector<1x16x45xf32> to vector<16x45xf32>
      %c5_i32_161 = arith.constant 5 : i32
      %168 = arith.addi %124, %c5_i32_161 : i32
      %c0_162 = arith.constant 0 : index
      %c0_163 = arith.constant 0 : index
      %169 = arith.index_cast %168 : i32 to index
      %c0_164 = arith.constant 0 : index
      %c0_165 = arith.constant 0 : index
      %170 = vector.load %arg2[%c0_162, %c0_163, %169, %c0_164, %c0_165] : memref<1x1x30x45x16xf32, #tpu.memory_space<vmem>>, vector<1x1x1x45x16xf32>
      %171 = vector.shape_cast %170 : vector<1x1x1x45x16xf32> to vector<45x16xf32>
      %cst_166 = arith.constant dense<0.000000e+00> : vector<16x16xf32>
      %172 = tpu.matmul %167, %171, %cst_166 {dimension_numbers = #tpu.dot_dimension_numbers<[1], [0], [0], [1], [0, 0, 1, 1], [], []>} : vector<16x45xf32>, vector<45x16xf32>, vector<16x16xf32> -> vector<16x16xf32>
      %173 = arith.addf %165, %172 : vector<16x16xf32>
      %c6_167 = arith.constant 6 : index
      %c0_168 = arith.constant 0 : index
      %c0_169 = arith.constant 0 : index
      %174 = vector.load %arg3[%c6_167, %c0_168, %c0_169] : memref<15x16x45xf32, #tpu.memory_space<vmem>>, vector<1x16x45xf32>
      %175 = vector.shape_cast %174 : vector<1x16x45xf32> to vector<16x45xf32>
      %c6_i32_170 = arith.constant 6 : i32
      %176 = arith.addi %124, %c6_i32_170 : i32
      %c0_171 = arith.constant 0 : index
      %c0_172 = arith.constant 0 : index
      %177 = arith.index_cast %176 : i32 to index
      %c0_173 = arith.constant 0 : index
      %c0_174 = arith.constant 0 : index
      %178 = vector.load %arg2[%c0_171, %c0_172, %177, %c0_173, %c0_174] : memref<1x1x30x45x16xf32, #tpu.memory_space<vmem>>, vector<1x1x1x45x16xf32>
      %179 = vector.shape_cast %178 : vector<1x1x1x45x16xf32> to vector<45x16xf32>
      %cst_175 = arith.constant dense<0.000000e+00> : vector<16x16xf32>
      %180 = tpu.matmul %175, %179, %cst_175 {dimension_numbers = #tpu.dot_dimension_numbers<[1], [0], [0], [1], [0, 0, 1, 1], [], []>} : vector<16x45xf32>, vector<45x16xf32>, vector<16x16xf32> -> vector<16x16xf32>
      %181 = arith.addf %173, %180 : vector<16x16xf32>
      %c7_176 = arith.constant 7 : index
      %c0_177 = arith.constant 0 : index
      %c0_178 = arith.constant 0 : index
      %182 = vector.load %arg3[%c7_176, %c0_177, %c0_178] : memref<15x16x45xf32, #tpu.memory_space<vmem>>, vector<1x16x45xf32>
      %183 = vector.shape_cast %182 : vector<1x16x45xf32> to vector<16x45xf32>
      %c7_i32_179 = arith.constant 7 : i32
      %184 = arith.addi %124, %c7_i32_179 : i32
      %c0_180 = arith.constant 0 : index
      %c0_181 = arith.constant 0 : index
      %185 = arith.index_cast %184 : i32 to index
      %c0_182 = arith.constant 0 : index
      %c0_183 = arith.constant 0 : index
      %186 = vector.load %arg2[%c0_180, %c0_181, %185, %c0_182, %c0_183] : memref<1x1x30x45x16xf32, #tpu.memory_space<vmem>>, vector<1x1x1x45x16xf32>
      %187 = vector.shape_cast %186 : vector<1x1x1x45x16xf32> to vector<45x16xf32>
      %cst_184 = arith.constant dense<0.000000e+00> : vector<16x16xf32>
      %188 = tpu.matmul %183, %187, %cst_184 {dimension_numbers = #tpu.dot_dimension_numbers<[1], [0], [0], [1], [0, 0, 1, 1], [], []>} : vector<16x45xf32>, vector<45x16xf32>, vector<16x16xf32> -> vector<16x16xf32>
      %189 = arith.addf %181, %188 : vector<16x16xf32>
      %c8_185 = arith.constant 8 : index
      %c0_186 = arith.constant 0 : index
      %c0_187 = arith.constant 0 : index
      %190 = vector.load %arg3[%c8_185, %c0_186, %c0_187] : memref<15x16x45xf32, #tpu.memory_space<vmem>>, vector<1x16x45xf32>
      %191 = vector.shape_cast %190 : vector<1x16x45xf32> to vector<16x45xf32>
      %c8_i32_188 = arith.constant 8 : i32
      %192 = arith.addi %124, %c8_i32_188 : i32
      %c0_189 = arith.constant 0 : index
      %c0_190 = arith.constant 0 : index
      %193 = arith.index_cast %192 : i32 to index
      %c0_191 = arith.constant 0 : index
      %c0_192 = arith.constant 0 : index
      %194 = vector.load %arg2[%c0_189, %c0_190, %193, %c0_191, %c0_192] : memref<1x1x30x45x16xf32, #tpu.memory_space<vmem>>, vector<1x1x1x45x16xf32>
      %195 = vector.shape_cast %194 : vector<1x1x1x45x16xf32> to vector<45x16xf32>
      %cst_193 = arith.constant dense<0.000000e+00> : vector<16x16xf32>
      %196 = tpu.matmul %191, %195, %cst_193 {dimension_numbers = #tpu.dot_dimension_numbers<[1], [0], [0], [1], [0, 0, 1, 1], [], []>} : vector<16x45xf32>, vector<45x16xf32>, vector<16x16xf32> -> vector<16x16xf32>
      %197 = arith.addf %189, %196 : vector<16x16xf32>
      %c9_194 = arith.constant 9 : index
      %c0_195 = arith.constant 0 : index
      %c0_196 = arith.constant 0 : index
      %198 = vector.load %arg3[%c9_194, %c0_195, %c0_196] : memref<15x16x45xf32, #tpu.memory_space<vmem>>, vector<1x16x45xf32>
      %199 = vector.shape_cast %198 : vector<1x16x45xf32> to vector<16x45xf32>
      %c9_i32_197 = arith.constant 9 : i32
      %200 = arith.addi %124, %c9_i32_197 : i32
      %c0_198 = arith.constant 0 : index
      %c0_199 = arith.constant 0 : index
      %201 = arith.index_cast %200 : i32 to index
      %c0_200 = arith.constant 0 : index
      %c0_201 = arith.constant 0 : index
      %202 = vector.load %arg2[%c0_198, %c0_199, %201, %c0_200, %c0_201] : memref<1x1x30x45x16xf32, #tpu.memory_space<vmem>>, vector<1x1x1x45x16xf32>
      %203 = vector.shape_cast %202 : vector<1x1x1x45x16xf32> to vector<45x16xf32>
      %cst_202 = arith.constant dense<0.000000e+00> : vector<16x16xf32>
      %204 = tpu.matmul %199, %203, %cst_202 {dimension_numbers = #tpu.dot_dimension_numbers<[1], [0], [0], [1], [0, 0, 1, 1], [], []>} : vector<16x45xf32>, vector<45x16xf32>, vector<16x16xf32> -> vector<16x16xf32>
      %205 = arith.addf %197, %204 : vector<16x16xf32>
      %c10_203 = arith.constant 10 : index
      %c0_204 = arith.constant 0 : index
      %c0_205 = arith.constant 0 : index
      %206 = vector.load %arg3[%c10_203, %c0_204, %c0_205] : memref<15x16x45xf32, #tpu.memory_space<vmem>>, vector<1x16x45xf32>
      %207 = vector.shape_cast %206 : vector<1x16x45xf32> to vector<16x45xf32>
      %c10_i32_206 = arith.constant 10 : i32
      %208 = arith.addi %124, %c10_i32_206 : i32
      %c0_207 = arith.constant 0 : index
      %c0_208 = arith.constant 0 : index
      %209 = arith.index_cast %208 : i32 to index
      %c0_209 = arith.constant 0 : index
      %c0_210 = arith.constant 0 : index
      %210 = vector.load %arg2[%c0_207, %c0_208, %209, %c0_209, %c0_210] : memref<1x1x30x45x16xf32, #tpu.memory_space<vmem>>, vector<1x1x1x45x16xf32>
      %211 = vector.shape_cast %210 : vector<1x1x1x45x16xf32> to vector<45x16xf32>
      %cst_211 = arith.constant dense<0.000000e+00> : vector<16x16xf32>
      %212 = tpu.matmul %207, %211, %cst_211 {dimension_numbers = #tpu.dot_dimension_numbers<[1], [0], [0], [1], [0, 0, 1, 1], [], []>} : vector<16x45xf32>, vector<45x16xf32>, vector<16x16xf32> -> vector<16x16xf32>
      %213 = arith.addf %205, %212 : vector<16x16xf32>
      %c11_212 = arith.constant 11 : index
      %c0_213 = arith.constant 0 : index
      %c0_214 = arith.constant 0 : index
      %214 = vector.load %arg3[%c11_212, %c0_213, %c0_214] : memref<15x16x45xf32, #tpu.memory_space<vmem>>, vector<1x16x45xf32>
      %215 = vector.shape_cast %214 : vector<1x16x45xf32> to vector<16x45xf32>
      %c11_i32_215 = arith.constant 11 : i32
      %216 = arith.addi %124, %c11_i32_215 : i32
      %c0_216 = arith.constant 0 : index
      %c0_217 = arith.constant 0 : index
      %217 = arith.index_cast %216 : i32 to index
      %c0_218 = arith.constant 0 : index
      %c0_219 = arith.constant 0 : index
      %218 = vector.load %arg2[%c0_216, %c0_217, %217, %c0_218, %c0_219] : memref<1x1x30x45x16xf32, #tpu.memory_space<vmem>>, vector<1x1x1x45x16xf32>
      %219 = vector.shape_cast %218 : vector<1x1x1x45x16xf32> to vector<45x16xf32>
      %cst_220 = arith.constant dense<0.000000e+00> : vector<16x16xf32>
      %220 = tpu.matmul %215, %219, %cst_220 {dimension_numbers = #tpu.dot_dimension_numbers<[1], [0], [0], [1], [0, 0, 1, 1], [], []>} : vector<16x45xf32>, vector<45x16xf32>, vector<16x16xf32> -> vector<16x16xf32>
      %221 = arith.addf %213, %220 : vector<16x16xf32>
      %c12_221 = arith.constant 12 : index
      %c0_222 = arith.constant 0 : index
      %c0_223 = arith.constant 0 : index
      %222 = vector.load %arg3[%c12_221, %c0_222, %c0_223] : memref<15x16x45xf32, #tpu.memory_space<vmem>>, vector<1x16x45xf32>
      %223 = vector.shape_cast %222 : vector<1x16x45xf32> to vector<16x45xf32>
      %c12_i32_224 = arith.constant 12 : i32
      %224 = arith.addi %124, %c12_i32_224 : i32
      %c0_225 = arith.constant 0 : index
      %c0_226 = arith.constant 0 : index
      %225 = arith.index_cast %224 : i32 to index
      %c0_227 = arith.constant 0 : index
      %c0_228 = arith.constant 0 : index
      %226 = vector.load %arg2[%c0_225, %c0_226, %225, %c0_227, %c0_228] : memref<1x1x30x45x16xf32, #tpu.memory_space<vmem>>, vector<1x1x1x45x16xf32>
      %227 = vector.shape_cast %226 : vector<1x1x1x45x16xf32> to vector<45x16xf32>
      %cst_229 = arith.constant dense<0.000000e+00> : vector<16x16xf32>
      %228 = tpu.matmul %223, %227, %cst_229 {dimension_numbers = #tpu.dot_dimension_numbers<[1], [0], [0], [1], [0, 0, 1, 1], [], []>} : vector<16x45xf32>, vector<45x16xf32>, vector<16x16xf32> -> vector<16x16xf32>
      %229 = arith.addf %221, %228 : vector<16x16xf32>
      %c13_230 = arith.constant 13 : index
      %c0_231 = arith.constant 0 : index
      %c0_232 = arith.constant 0 : index
      %230 = vector.load %arg3[%c13_230, %c0_231, %c0_232] : memref<15x16x45xf32, #tpu.memory_space<vmem>>, vector<1x16x45xf32>
      %231 = vector.shape_cast %230 : vector<1x16x45xf32> to vector<16x45xf32>
      %c13_i32_233 = arith.constant 13 : i32
      %232 = arith.addi %124, %c13_i32_233 : i32
      %c0_234 = arith.constant 0 : index
      %c0_235 = arith.constant 0 : index
      %233 = arith.index_cast %232 : i32 to index
      %c0_236 = arith.constant 0 : index
      %c0_237 = arith.constant 0 : index
      %234 = vector.load %arg2[%c0_234, %c0_235, %233, %c0_236, %c0_237] : memref<1x1x30x45x16xf32, #tpu.memory_space<vmem>>, vector<1x1x1x45x16xf32>
      %235 = vector.shape_cast %234 : vector<1x1x1x45x16xf32> to vector<45x16xf32>
      %cst_238 = arith.constant dense<0.000000e+00> : vector<16x16xf32>
      %236 = tpu.matmul %231, %235, %cst_238 {dimension_numbers = #tpu.dot_dimension_numbers<[1], [0], [0], [1], [0, 0, 1, 1], [], []>} : vector<16x45xf32>, vector<45x16xf32>, vector<16x16xf32> -> vector<16x16xf32>
      %237 = arith.addf %229, %236 : vector<16x16xf32>
      %c14_239 = arith.constant 14 : index
      %c0_240 = arith.constant 0 : index
      %c0_241 = arith.constant 0 : index
      %238 = vector.load %arg3[%c14_239, %c0_240, %c0_241] : memref<15x16x45xf32, #tpu.memory_space<vmem>>, vector<1x16x45xf32>
      %239 = vector.shape_cast %238 : vector<1x16x45xf32> to vector<16x45xf32>
      %c14_i32_242 = arith.constant 14 : i32
      %240 = arith.addi %124, %c14_i32_242 : i32
      %c0_243 = arith.constant 0 : index
      %c0_244 = arith.constant 0 : index
      %241 = arith.index_cast %240 : i32 to index
      %c0_245 = arith.constant 0 : index
      %c0_246 = arith.constant 0 : index
      %242 = vector.load %arg2[%c0_243, %c0_244, %241, %c0_245, %c0_246] : memref<1x1x30x45x16xf32, #tpu.memory_space<vmem>>, vector<1x1x1x45x16xf32>
      %243 = vector.shape_cast %242 : vector<1x1x1x45x16xf32> to vector<45x16xf32>
      %cst_247 = arith.constant dense<0.000000e+00> : vector<16x16xf32>
      %244 = tpu.matmul %239, %243, %cst_247 {dimension_numbers = #tpu.dot_dimension_numbers<[1], [0], [0], [1], [0, 0, 1, 1], [], []>} : vector<16x45xf32>, vector<45x16xf32>, vector<16x16xf32> -> vector<16x16xf32>
      %245 = arith.addf %237, %244 : vector<16x16xf32>
      %246 = arith.maximumf %122, %245 : vector<16x16xf32>
      %247 = vector.extract_strided_slice %246 {offsets = [0, 0], sizes = [16, 8], strides = [1, 1]} : vector<16x16xf32> to vector<16x8xf32>
      %248 = vector.extract_strided_slice %246 {offsets = [0, 8], sizes = [16, 8], strides = [1, 1]} : vector<16x16xf32> to vector<16x8xf32>
      %249 = arith.maximumf %247, %248 : vector<16x8xf32>
      %cst_248 = arith.constant 0.000000e+00 : f32
      %250 = vector.broadcast %cst_248 : f32 to vector<16x8xf32>
      %251 = arith.maximumf %249, %250 : vector<16x8xf32>
      %c0_249 = arith.constant 0 : index
      %252 = arith.index_cast %arg5 : i32 to index
      %c0_250 = arith.constant 0 : index
      %c0_251 = arith.constant 0 : index
      %253 = vector.load %arg4[%c0_249, %252, %c0_250, %c0_251] : memref<1x8x16x8xf32, #tpu.memory_space<vmem>>, vector<1x1x16x8xf32>
      %254 = vector.shape_cast %253 : vector<1x1x16x8xf32> to vector<16x8xf32>
      %255 = vector.shape_cast %251 : vector<16x8xf32> to vector<1x1x16x8xf32>
      tpu.vector_store %arg4[%c0_249, %252, %c0_250, %c0_251], %255 {strides = array<i32>} : memref<1x8x16x8xf32, #tpu.memory_space<vmem>>, vector<1x1x16x8xf32>,
    }
    %c8_i32_0 = arith.constant 8 : i32
    return
  }
  func.func @transform_0(%arg0: i32, %arg1: i32) -> (i32, i32, i32, i32, i32) {
    %c0_i32 = arith.constant 0 : i32
    %c0_i32_0 = arith.constant 0 : i32
    %c0_i32_1 = arith.constant 0 : i32
    %c0_i32_2 = arith.constant 0 : i32
    return %arg0, %arg1, %c0_i32, %c0_i32_0, %c0_i32_1 : i32, i32, i32, i32, i32
  }
  func.func @transform_1(%arg0: i32, %arg1: i32) -> (i32, i32, i32) {
    %c0_i32 = arith.constant 0 : i32
    %c0_i32_0 = arith.constant 0 : i32
    %c0_i32_1 = arith.constant 0 : i32
    %c0_i32_2 = arith.constant 0 : i32
    return %c0_i32, %c0_i32_0, %c0_i32_1 : i32, i32, i32
  }
  func.func @transform_2(%arg0: i32, %arg1: i32) -> (i32, i32, i32, i32) {
    %c0_i32 = arith.constant 0 : i32
    %c0_i32_0 = arith.constant 0 : i32
    %c0_i32_1 = arith.constant 0 : i32
    return %arg0, %arg1, %c0_i32, %c0_i32_0 : i32, i32, i32, i32
  }
}

</mosaic_0001>

<bundles_post_ra>
// kernel: wavelet_layers_forward.1
= control target key start
LH: loop header
LB: loop body
LE: loop exit
PB: predicated region body
PF: predicated region fallthrough
CT: control target
= control target key end

     0   :  { %s4505_s9 = smov 0   ;;  %s4507_s10 = smov 0   ;;  %s4944_s0 = inlined_call_operand.vmem [shape: f32[2,1,30,45,16], index: 0, kind: input, shape index: {}]   ;;  %s4945_s1 = inlined_call_operand.vmem [shape: f32[15,16,45], index: 1, kind: input, shape index: {}]   ;;  %s4946_s2 = inlined_call_operand.vmem [shape: f32[2,8,16,8], index: 2, kind: output, shape index: {}]  }
   0x1   :  { %s4509_s11 = smov 0  }
   0x2 LB: > { %s24_s12 = sadd.s32 1, %s4478_s10  ;;  %p3007_p0 = scmp.ge.s32.totalorder %s4482_s11, 1  ;;  %s4482_s11 = sphi %s4509_s11, %s12_s11   ;;  %s4478_s10 = sphi %s4507_s10, %s4950_s10   ;;  %s4474_s9 = sphi %s4505_s9, %s4949_s9  }
   0x3   : > { %p26_p1 = scmp.ge.s32.totalorder %s24_s12, 2  ;;  %p132_p2 = scmp.lt.s32.totalorder %s4482_s11, 3 }
   0x5   : > { %s4952_s12 = smov (%p26_p1, %s24_s12), 0  ;;  %p133_p3 = pnand %p3007_p0, %p132_p2 }
   0x6   : > { %p163_p4 = scmp.lt.s32.totalorder (!%p133_p3), %s4474_s9, 1  ;;  %s4533_s21 = smov (!%p133_p3), 0  }
   0x7   : > { %136 = sbr.rel (%p133_p3) target bundleno = 544 (0x220), region = 28 }
   0xe   : > { %s4954_s9 = smov (!%p163_p4, %s4474_s9), 1 }
   0xf   : > { %s4421_s13 = smul.u32 1440, %s4954_s9  ;;  %s3254_s14 = sshll.u32 %s4954_s9, 7 }
  0x10   : > { %s4526_s17 = scalar_lea.vmem %s4946_s2, %s3254_s14 }
  0x11   : > { %s4531_s20 = scalar_lea.vmem %s4944_s0, %s4421_s13 }
  0x12 LB: >> { %v3013_v0 = vld [vmem:[%s4945_s1 + $0x10] sm:$0xff]  ;;  %vm212_vm0 = vcmask 367616   ;;  %s3012_s24 = smul.u32 96, %s4486_s21  ;;  %vm219_vm1 = vcmask 1044480   ;;  %vm4488_vm2 = vmmov 1   ;;  %v3014_v25 = vld [vmem:[%s4945_s1 + $0x18] sm:$0xff]  ;;  %s4486_s21 = sphi %s4533_s21, %s188_s21  }
  0x13   : >> { %3507 = vmatprep.mubr.msk.f32.mxu0 %vm212_vm0, %v3013_v0  ;;  %3732 = vmatprep.mubr.msk.f32.mxu1 %vm212_vm0, %v3013_v0  ;;  %vm4566_vm3 = vmpackc.low %vm219_vm1, %vm4488_vm2  ;;  %v190_v29 = vld [vmem:[%s4945_s1] sm:$0xff]  ;;  %v191_v36 = vld [vmem:[%s4945_s1 + $0x8] sm:$0xff]  ;;  %s4489_s16 = smov 120   ;;  %s3251_s18 = sshll.u32 %s4486_s21, 4  ;;  %vm2835_vm4 = vcmask 64512  }
  0x14   : >> { %s4545_s25 = scalar_lea.vmem %s4531_s20, %s3012_s24  ;;  %v3029_v40 = vld [vmem:[%s4945_s1 + $0x20] sm:$0xff]  ;;  %v3030_v47 = vld [vmem:[%s4945_s1 + $0x28] sm:$0xff]  ;;  %v3042_v51 = vld [vmem:[%s4945_s1 + $0x30] sm:$0xff]  ;;  %s2834_s19 = scalar_lea.vmem %s4526_s17, %s3251_s18 }
  0x15   : >> { %v3017_v1 = vld [vmem:[%s4545_s25 + $0x30] sm:$0xff]  ;;  %v3018_v2 = vld [vmem:[%s4545_s25 + $0x38] sm:$0xff]  ;;  %v3033_v3 = vld [vmem:[%s4545_s25 + $0x60] sm:$0xff]  ;;  %s188_s21 = sadd.s32 1, %s4486_s21  }
  0x16   : >> { %v3945_v4 = vpack.c.bf16 %v3018_v2, %v3017_v1  ;;  %v3034_v5 = vld [vmem:[%s4545_s25 + $0x68] sm:$0xff]  ;;  %v3019_v6 = vld [vmem:[%s4545_s25 + $0x40] sm:$0xff]  ;;  %v3035_v10 = vld [vmem:[%s4545_s25 + $0x70] sm:$0xff]  ;;  %p185_p5 = scmp.ge.s32.totalorder %s188_s21, 8  }
  0x17   : >> { %v3020_v7 = vld [vmem:[%s4545_s25 + $0x48] sm:$0xff]  ;;  %v4553_v8 = vpack.c.bf16 %v3034_v5, %v3033_v3  ;;  %v3036_v11 = vld [vmem:[%s4545_s25 + $0x78] sm:$0xff]  ;;  %v3021_v12 = vld [vmem:[%s4545_s25 + $0x50] sm:$0xff] }
  0x18   : >> { %v3949_v9 = vpack.c.bf16 %v3020_v7, %v3019_v6  ;;  %3946 = vmatprep.subr.bf16.mxu0 %v3945_v4  ;;  %v4558_v13 = vpack.c.bf16 %v3036_v11, %v3035_v10  ;;  %v3022_v14 = vld [vmem:[%s4545_s25 + $0x58] sm:$0x1f]  ;;  %v3037_v15 = vld [vmem:[%s4545_s25 + $0x80] sm:$0xff]  ;;  %v3038_v16 = vld [vmem:[%s4545_s25 + $0x88] sm:$0x1f] }
  0x19   : >> { %4156 = vmatprep.subr.bf16.mxu1 %v4553_v8  ;;  %3948 = vmatpush3.bf16.msra.mxu0 %v3945_v4  ;;  %v3953_v17 = vpack.c.bf16 %v3022_v14, %v3021_v12  ;;  %v4570_v19 = vpack.c.bf16 %v3038_v16, %v3037_v15  ;;  %v194_v20 = vld [vmem:[%s4545_s25] sm:$0xff]  ;;  %v195_v21 = vld [vmem:[%s4545_s25 + $0x8] sm:$0xff]  ;;  %v196_v23 = vld [vmem:[%s4545_s25 + $0x10] sm:$0xff] }
  0x1a   : >> { %4158 = vmatpush3.bf16.msra.mxu1 %v4553_v8  ;;  %3950 = vmatprep.subr.bf16.mxu0 %v3949_v9  ;;  %v3959_v22 = vpack.c.bf16 %v195_v21, %v194_v20  ;;  %v197_v24 = vld [vmem:[%s4545_s25 + $0x18] sm:$0xff]  ;;  %v198_v27 = vld [vmem:[%s4545_s25 + $0x20] sm:$0xff]  ;;  %v199_v28 = vld [vmem:[%s4545_s25 + $0x28] sm:$0x1f] }
  0x1b   : >> { %4160 = vmatprep.subr.bf16.mxu1 %v4558_v13  ;;  %v3963_v26 = vpack.c.bf16 %v197_v24, %v196_v23  ;;  %v3967_v30 = vpack.c.bf16 %v199_v28, %v198_v27  ;;  %v3046_v31 = vld [vmem:[%s4545_s25 + $0x90] sm:$0xff]  ;;  %v3047_v32 = vld [vmem:[%s4545_s25 + $0x98] sm:$0xff]  ;;  %v3048_v34 = vld [vmem:[%s4545_s25 + $0xa0] sm:$0xff] }
  0x1c   : >> { %v3987_v33 = vpack.c.bf16 %v3047_v32, %v3046_v31  ;;  %v3049_v35 = vld [vmem:[%s4545_s25 + $0xa8] sm:$0xff]  ;;  %v3050_v38 = vld [vmem:[%s4545_s25 + $0xb0] sm:$0xff]  ;;  %v3051_v39 = vld [vmem:[%s4545_s25 + $0xb8] sm:$0x1f] }
  0x1d   : >> { %3952 = vmatpush3.bf16.msra.mxu0 %v3949_v9  ;;  %v3991_v37 = vpack.c.bf16 %v3049_v35, %v3048_v34  ;;  %v3995_v41 = vpack.c.bf16 %v3051_v39, %v3050_v38  ;;  %v3059_v42 = vld [vmem:[%s4545_s25 + $0xc0] sm:$0xff]  ;;  %v3060_v43 = vld [vmem:[%s4545_s25 + $0xc8] sm:$0xff]  ;;  %v3061_v45 = vld [vmem:[%s4545_s25 + $0xd0] sm:$0xff] }
  0x1e   : >> { %4162 = vmatpush3.bf16.msra.mxu1 %v4558_v13  ;;  %3955 = vmatprep.subr.msk.bf16.mxu0 %vm4566_vm3, %v3953_v17  ;;  %v4001_v44 = vpack.c.bf16 %v3060_v43, %v3059_v42  ;;  %v3062_v46 = vld [vmem:[%s4545_s25 + $0xd8] sm:$0xff]  ;;  %v3063_v49 = vld [vmem:[%s4545_s25 + $0xe0] sm:$0xff]  ;;  %v3064_v50 = vld [vmem:[%s4545_s25 + $0xe8] sm:$0x1f] }
  0x1f   : >> { %4165 = vmatprep.subr.msk.bf16.mxu1 %vm4566_vm3, %v4570_v19  ;;  %v4005_v48 = vpack.c.bf16 %v3062_v46, %v3061_v45  ;;  %v4009_v52 = vpack.c.bf16 %v3064_v50, %v3063_v49  ;;  %v3072_v53 = vld [vmem:[%s4545_s25 + $0xf0] sm:$0xff]  ;;  %v3073_v54 = vld [vmem:[%s4545_s25 + $0xf8] sm:$0xff]  ;;  %v3074_v56 = vld [vmem:[%s4545_s25 + $0x100] sm:$0xff] }
  0x20   : >> { %v4015_v55 = vpack.c.bf16 %v3073_v54, %v3072_v53  ;;  %v3075_v57 = vld [vmem:[%s4545_s25 + $0x108] sm:$0xff]  ;;  %v3043_v58 = vld [vmem:[%s4945_s1 + $0x38] sm:$0xff]  ;;  %v3076_v60 = vld [vmem:[%s4545_s25 + $0x110] sm:$0xff] }
  0x21   : >> { %3958 = vmatpush3.bf16.msk.msra.mxu0 %vm4566_vm3, %v3953_v17  ;;  %v4019_v59 = vpack.c.bf16 %v3075_v57, %v3074_v56  ;;  %v3077_v61 = vld [vmem:[%s4545_s25 + $0x118] sm:$0x1f]  ;;  %v3055_v62 = vld [vmem:[%s4945_s1 + $0x40] sm:$0xff]  ;;  %v3086_v1 = vld [vmem:[%s4545_s25 + $0x128] sm:$0xff] }
  0x22   : >> { %4168 = vmatpush3.bf16.msk.msra.mxu1 %vm4566_vm3, %v4570_v19  ;;  %3960 = vmatprep.subr.bf16.mxu0 %v3959_v22  ;;  %v4023_v63 = vpack.c.bf16 %v3077_v61, %v3076_v60  ;;  %v3085_v0 = vld [vmem:[%s4545_s25 + $0x120] sm:$0xff]  ;;  %v3087_v3 = vld [vmem:[%s4545_s25 + $0x130] sm:$0xff]  ;;  %v3056_v5 = vld [vmem:[%s4945_s1 + $0x48] sm:$0xff] }
  0x23   : >> { %4170 = vmatprep.subr.bf16.mxu1 %v3945_v4  ;;  %v4029_v2 = vpack.c.bf16 %v3086_v1, %v3085_v0  ;;  %v3089_v7 = vld [vmem:[%s4545_s25 + $0x140] sm:$0xff]  ;;  %v3098_v11 = vld [vmem:[%s4545_s25 + $0x150] sm:$0xff]  ;;  %v3099_v12 = vld [vmem:[%s4545_s25 + $0x158] sm:$0xff] }
  0x24   : >> { %3508 = vmatmul.mubr.msk.f32.vlgmr.msra.gmra.mrb[0].mxu0 %vm212_vm0, %v3014_v25  ;;  %v3100_v14 = vld [vmem:[%s4545_s25 + $0x160] sm:$0xff]  ;;  %v3101_v15 = vld [vmem:[%s4545_s25 + $0x168] sm:$0xff]  ;;  %v3069_v16 = vld [vmem:[%s4945_s1 + $0x58] sm:$0xff] }
  0x25   : >> { %3962 = vmatpush3.bf16.msra.mxu0 %v3959_v22  ;;  %3733 = vmatmul.mubr.msk.f32.vlgmr.msra.gmra.mrb[0].mxu1 %vm212_vm0, %v3014_v25  ;;  %v3103_v20 = vld [vmem:[%s4545_s25 + $0x178] sm:$0x1f]  ;;  %v3081_v21 = vld [vmem:[%s4945_s1 + $0x60] sm:$0xff]  ;;  %v3112_v24 = vld [vmem:[%s4545_s25 + $0x188] sm:$0xff] }
  0x26   : >> { %4172 = vmatpush3.bf16.msra.mxu1 %v3945_v4  ;;  %3964 = vmatprep.subr.bf16.mxu0 %v3963_v26  ;;  %v3088_v4 = vld [vmem:[%s4545_s25 + $0x138] sm:$0xff]  ;;  %v3111_v23 = vld [vmem:[%s4545_s25 + $0x180] sm:$0xff]  ;;  %v3082_v28 = vld [vmem:[%s4945_s1 + $0x68] sm:$0xff] }
  0x27   : >> { %4174 = vmatprep.subr.bf16.mxu1 %v3949_v9  ;;  %3522 = vmatprep.mubr.msk.f32.mxu0 %vm212_vm0, %v190_v29  ;;  %v4033_v6 = vpack.c.bf16 %v3088_v4, %v3087_v3  ;;  %v4057_v25 = vpack.c.bf16 %v3112_v24, %v3111_v23  ;;  %v3114_v27 = vld [vmem:[%s4545_s25 + $0x198] sm:$0xff]  ;;  %v3116_v31 = vld [vmem:[%s4545_s25 + $0x1a8] sm:$0x1f]  ;;  %v3094_v32 = vld [vmem:[%s4945_s1 + $0x70] sm:$0xff] }
  0x28   : >> { %3747 = vmatprep.mubr.msk.f32.mxu1 %vm212_vm0, %v190_v29  ;;  %v3124_v34 = vld [vmem:[%s4545_s25 + $0x1b0] sm:$0xff]  ;;  %v3125_v35 = vld [vmem:[%s4545_s25 + $0x1b8] sm:$0xff]  ;;  %v3127_v38 = vld [vmem:[%s4545_s25 + $0x1c8] sm:$0xff] }
  0x29   : >> { %3966 = vmatpush3.bf16.msra.mxu0 %v3963_v26  ;;  %v3113_v26 = vld [vmem:[%s4545_s25 + $0x190] sm:$0xff]  ;;  %v3095_v39 = vld [vmem:[%s4945_s1 + $0x78] sm:$0xff]  ;;  %v3107_v43 = vld [vmem:[%s4945_s1 + $0x80] sm:$0xff] }
  0x2a   : >> { %4176 = vmatpush3.bf16.msra.mxu1 %v3949_v9  ;;  %3969 = vmatprep.subr.msk.bf16.mxu0 %vm4566_vm3, %v3967_v30  ;;  %v3068_v9 = vld [vmem:[%s4945_s1 + $0x50] sm:$0xff]  ;;  %v4061_v29 = vpack.c.bf16 %v3114_v27, %v3113_v26  ;;  %v3129_v42 = vld [vmem:[%s4545_s25 + $0x1d8] sm:$0x1f]  ;;  %v3137_v45 = vld [vmem:[%s4545_s25 + $0x1e0] sm:$0xff] }
  0x2b   : >> { %4179 = vmatprep.subr.msk.bf16.mxu1 %vm4566_vm3, %v3953_v17  ;;  %v3138_v46 = vld [vmem:[%s4545_s25 + $0x1e8] sm:$0xff]  ;;  %v3140_v49 = vld [vmem:[%s4545_s25 + $0x1f8] sm:$0xff]  ;;  %v3120_v54 = vld [vmem:[%s4945_s1 + $0x90] sm:$0xff] }
  0x2c   : >> { %v3108_v50 = vld [vmem:[%s4945_s1 + $0x88] sm:$0xff]  ;;  %v3150_v56 = vld [vmem:[%s4545_s25 + $0x210] sm:$0xff]  ;;  %v3151_v57 = vld [vmem:[%s4545_s25 + $0x218] sm:$0xff] }
  0x2d   : >> { %3972 = vmatpush3.bf16.msk.msra.mxu0 %vm4566_vm3, %v3967_v30  ;;  %v3115_v30 = vld [vmem:[%s4545_s25 + $0x1a0] sm:$0xff]  ;;  %v3142_v53 = vld [vmem:[%s4545_s25 + $0x208] sm:$0x1f]  ;;  %v3121_v61 = vld [vmem:[%s4945_s1 + $0x98] sm:$0xff] }
  0x2e   : >> { %4182 = vmatpush3.bf16.msk.msra.mxu1 %vm4566_vm3, %v3953_v17  ;;  %3974 = vmatprep.subr.bf16.mxu0 %v4553_v8  ;;  %v4047_v17 = vpack.c.bf16 %v3101_v15, %v3100_v14  ;;  %v3153_v60 = vld [vmem:[%s4545_s25 + $0x228] sm:$0xff]  ;;  %v3155_v0 = vld [vmem:[%s4545_s25 + $0x238] sm:$0x1f]  ;;  %v3133_v1 = vld [vmem:[%s4945_s1 + $0xa0] sm:$0xff] }
  0x2f   : >> { %4184 = vmatprep.subr.bf16.mxu1 %v3987_v33  ;;  %v3163_v3 = vld [vmem:[%s4545_s25 + $0x240] sm:$0xff]  ;;  %v3164_v4 = vld [vmem:[%s4545_s25 + $0x248] sm:$0xff]  ;;  %v3176_v14 = vld [vmem:[%s4545_s25 + $0x270] sm:$0xff] }
  0x30   : >> { %3523 = vmatmul.mubr.msk.f32.vlgmr.msra.gmra.mrb[0].mxu0 %vm212_vm0, %v191_v36  ;;  %v3177_v15 = vld [vmem:[%s4545_s25 + $0x278] sm:$0xff]  ;;  %v3159_v24 = vld [vmem:[%s4945_s1 + $0xc0] sm:$0xff]  ;;  %v3190_v27 = vld [vmem:[%s4545_s25 + $0x2a8] sm:$0xff] }
  0x31   : >> { %3976 = vmatpush3.bf16.msra.mxu0 %v4553_v8  ;;  %3748 = vmatmul.mubr.msk.f32.vlgmr.msra.gmra.mrb[0].mxu1 %vm212_vm0, %v191_v36  ;;  %v3090_v8 = vld [vmem:[%s4545_s25 + $0x148] sm:$0x1f]  ;;  %v4071_v36 = vpack.c.bf16 %v3125_v35, %v3124_v34  ;;  %v3181_v23 = vld [vmem:[%s4545_s25 + $0x298] sm:$0x1f]  ;;  %v3189_v26 = vld [vmem:[%s4545_s25 + $0x2a0] sm:$0xff] }
  0x32   : >> { %4186 = vmatpush3.bf16.msra.mxu1 %v3987_v33  ;;  %3978 = vmatprep.subr.bf16.mxu0 %v4558_v13  ;;  %v4037_v10 = vpack.c.bf16 %v3090_v8, %v3089_v7  ;;  %v3166_v7 = vld [vmem:[%s4545_s25 + $0x258] sm:$0xff]  ;;  %v3134_v8 = vld [vmem:[%s4945_s1 + $0xa8] sm:$0xff]  ;;  %v3172_v35 = vld [vmem:[%s4945_s1 + $0xd0] sm:$0xff] }
  0x33   : >> { %4188 = vmatprep.subr.bf16.mxu1 %v3991_v37  ;;  %3537 = vmatprep.mubr.msk.f32.mxu0 %vm212_vm0, %v3029_v40  ;;  %v3194_v34 = vld [vmem:[%s4545_s25 + $0x2c8] sm:$0x1f] }
  0x34   : >> { %3762 = vmatprep.mubr.msk.f32.mxu1 %vm212_vm0, %v3029_v40 }
  0x35   : >> { %3980 = vmatpush3.bf16.msra.mxu0 %v4558_v13  ;;  %v4043_v13 = vpack.c.bf16 %v3099_v12, %v3098_v11  ;;  %v3168_v11 = vld [vmem:[%s4545_s25 + $0x268] sm:$0x1f]  ;;  %v3146_v12 = vld [vmem:[%s4945_s1 + $0xb0] sm:$0xff] }
  0x36   : >> { %4190 = vmatpush3.bf16.msra.mxu1 %v3991_v37  ;;  %3983 = vmatprep.subr.msk.bf16.mxu0 %vm4566_vm3, %v4570_v19 }
  0x37   : >> { %4193 = vmatprep.subr.msk.bf16.mxu1 %vm4566_vm3, %v3995_v41 }
  0x39   : >> { %3986 = vmatpush3.bf16.msk.msra.mxu0 %vm4566_vm3, %v4570_v19  ;;  %v3102_v19 = vld [vmem:[%s4545_s25 + $0x170] sm:$0xff] }
  0x3a   : >> { %4196 = vmatpush3.bf16.msk.msra.mxu1 %vm4566_vm3, %v3995_v41  ;;  %3988 = vmatprep.subr.bf16.mxu0 %v3987_v33  ;;  %v4051_v22 = vpack.c.bf16 %v3103_v20, %v3102_v19  ;;  %v3179_v19 = vld [vmem:[%s4545_s25 + $0x288] sm:$0xff]  ;;  %v3147_v20 = vld [vmem:[%s4945_s1 + $0xb8] sm:$0xff] }
  0x3b   : >> { %4198 = vmatprep.subr.bf16.mxu1 %v4001_v44 }
  0x3c   : >> { %3538 = vmatmul.mubr.msk.f32.vlgmr.msra.gmra.mrb[0].mxu0 %vm212_vm0, %v3030_v47 }
  0x3d   : >> { %3990 = vmatpush3.bf16.msra.mxu0 %v3987_v33  ;;  %3763 = vmatmul.mubr.msk.f32.vlgmr.msra.gmra.mrb[0].mxu1 %vm212_vm0, %v3030_v47  ;;  %v4065_v33 = vpack.c.bf16 %v3116_v31, %v3115_v30  ;;  %v4085_v47 = vpack.c.bf16 %v3138_v46, %v3137_v45  ;;  %v3192_v30 = vld [vmem:[%s4545_s25 + $0x2b8] sm:$0xff]  ;;  %v3160_v31 = vld [vmem:[%s4945_s1 + $0xc8] sm:$0xff]  ;;  %v3185_v46 = vld [vmem:[%s4945_s1 + $0xe0] sm:$0xff] }
  0x3e   : >> { %4200 = vmatpush3.bf16.msra.mxu1 %v4001_v44  ;;  %3992 = vmatprep.subr.bf16.mxu0 %v3991_v37  ;;  %v3247_v45 = vld [vmem:[%s4545_s25 + $0x2f8] sm:$0x1f] }
  0x3f   : >> { %4202 = vmatprep.subr.bf16.mxu1 %v4005_v48  ;;  %3552 = vmatprep.mubr.msk.f32.mxu0 %vm212_vm0, %v3042_v51 }
  0x40   : >> { %3777 = vmatprep.mubr.msk.f32.mxu1 %vm212_vm0, %v3042_v51 }
  0x41   : >> { %3994 = vmatpush3.bf16.msra.mxu0 %v3991_v37  ;;  %v3126_v37 = vld [vmem:[%s4545_s25 + $0x1c0] sm:$0xff] }
  0x42   : >> { %4204 = vmatpush3.bf16.msra.mxu1 %v4005_v48  ;;  %3997 = vmatprep.subr.msk.bf16.mxu0 %vm4566_vm3, %v3995_v41  ;;  %v4075_v40 = vpack.c.bf16 %v3127_v38, %v3126_v37  ;;  %v3242_v37 = vld [vmem:[%s4545_s25 + $0x2d0] sm:$0xff]  ;;  %v3243_v38 = vld [vmem:[%s4545_s25 + $0x2d8] sm:$0xff] }
  0x43   : >> { %4207 = vmatprep.subr.msk.bf16.mxu1 %vm4566_vm3, %v4009_v52 }
  0x45   : >> { %4000 = vmatpush3.bf16.msk.msra.mxu0 %vm4566_vm3, %v3995_v41  ;;  %v3128_v41 = vld [vmem:[%s4545_s25 + $0x1d0] sm:$0xff] }
  0x46   : >> { %4210 = vmatpush3.bf16.msk.msra.mxu1 %vm4566_vm3, %v4009_v52  ;;  %4002 = vmatprep.subr.bf16.mxu0 %v4001_v44 }
  0x47   : >> { %4212 = vmatprep.subr.bf16.mxu1 %v4015_v55 }
  0x48   : >> { %3553 = vmatmul.mubr.msk.f32.vlgmr.msra.gmra.mrb[0].mxu0 %vm212_vm0, %v3043_v58 }
  0x49   : >> { %4004 = vmatpush3.bf16.msra.mxu0 %v4001_v44  ;;  %3778 = vmatmul.mubr.msk.f32.vlgmr.msra.gmra.mrb[0].mxu1 %vm212_vm0, %v3043_v58  ;;  %v4079_v44 = vpack.c.bf16 %v3129_v42, %v3128_v41  ;;  %v4099_v58 = vpack.c.bf16 %v3151_v57, %v3150_v56  ;;  %v3245_v41 = vld [vmem:[%s4545_s25 + $0x2e8] sm:$0xff]  ;;  %v3173_v42 = vld [vmem:[%s4945_s1 + $0xd8] sm:$0xff] }
  0x4a   : >> { %4214 = vmatpush3.bf16.msra.mxu1 %v4015_v55  ;;  %4006 = vmatprep.subr.bf16.mxu0 %v4005_v48 }
  0x4b   : >> { %4216 = vmatprep.subr.bf16.mxu1 %v4019_v59  ;;  %3567 = vmatprep.mubr.msk.f32.mxu0 %vm212_vm0, %v3055_v62 }
  0x4c   : >> { %3792 = vmatprep.mubr.msk.f32.mxu1 %vm212_vm0, %v3055_v62 }
  0x4d   : >> { %4008 = vmatpush3.bf16.msra.mxu0 %v4005_v48  ;;  %v3139_v48 = vld [vmem:[%s4545_s25 + $0x1f0] sm:$0xff] }
  0x4e   : >> { %4218 = vmatpush3.bf16.msra.mxu1 %v4019_v59  ;;  %4011 = vmatprep.subr.msk.bf16.mxu0 %vm4566_vm3, %v4009_v52  ;;  %v4089_v51 = vpack.c.bf16 %v3140_v49, %v3139_v48  ;;  %v3186_v48 = vld [vmem:[%s4945_s1 + $0xe8] sm:$0xff] }
  0x4f   : >> { %4221 = vmatprep.subr.msk.bf16.mxu1 %vm4566_vm3, %v4023_v63 }
  0x51   : >> { %4014 = vmatpush3.bf16.msk.msra.mxu0 %vm4566_vm3, %v4009_v52  ;;  %v3141_v52 = vld [vmem:[%s4545_s25 + $0x200] sm:$0xff] }
  0x52   : >> { %4224 = vmatpush3.bf16.msk.msra.mxu1 %vm4566_vm3, %v4023_v63  ;;  %4016 = vmatprep.subr.bf16.mxu0 %v4015_v55 }
  0x53   : >> { %4226 = vmatprep.subr.bf16.mxu1 %v4029_v2 }
  0x54   : >> { %3568 = vmatmul.mubr.msk.f32.vlgmr.msra.gmra.mrb[0].mxu0 %vm212_vm0, %v3056_v5 }
  0x55   : >> { %4018 = vmatpush3.bf16.msra.mxu0 %v4015_v55  ;;  %3793 = vmatmul.mubr.msk.f32.vlgmr.msra.gmra.mrb[0].mxu1 %vm212_vm0, %v3056_v5  ;;  %v4093_v55 = vpack.c.bf16 %v3142_v53, %v3141_v52  ;;  %v4113_v5 = vpack.c.bf16 %v3164_v4, %v3163_v3 }
  0x56   : >> { %4228 = vmatpush3.bf16.msra.mxu1 %v4029_v2  ;;  %4020 = vmatprep.subr.bf16.mxu0 %v4019_v59 }
  0x57   : >> { %4230 = vmatprep.subr.bf16.mxu1 %v4033_v6  ;;  %3582 = vmatprep.mubr.msk.f32.mxu0 %vm212_vm0, %v3068_v9 }
  0x58   : >> { %3807 = vmatprep.mubr.msk.f32.mxu1 %vm212_vm0, %v3068_v9 }
  0x59   : >> { %4022 = vmatpush3.bf16.msra.mxu0 %v4019_v59  ;;  %v3152_v59 = vld [vmem:[%s4545_s25 + $0x220] sm:$0xff] }
  0x5a   : >> { %4232 = vmatpush3.bf16.msra.mxu1 %v4033_v6  ;;  %4025 = vmatprep.subr.msk.bf16.mxu0 %vm4566_vm3, %v4023_v63  ;;  %v4103_v62 = vpack.c.bf16 %v3153_v60, %v3152_v59 }
  0x5b   : >> { %4235 = vmatprep.subr.msk.bf16.mxu1 %vm4566_vm3, %v4037_v10 }
  0x5d   : >> { %4028 = vmatpush3.bf16.msk.msra.mxu0 %vm4566_vm3, %v4023_v63  ;;  %v3154_v63 = vld [vmem:[%s4545_s25 + $0x230] sm:$0xff] }
  0x5e   : >> { %4238 = vmatpush3.bf16.msk.msra.mxu1 %vm4566_vm3, %v4037_v10  ;;  %4030 = vmatprep.subr.bf16.mxu0 %v4029_v2 }
  0x5f   : >> { %4240 = vmatprep.subr.bf16.mxu1 %v4043_v13 }
  0x60   : >> { %3583 = vmatmul.mubr.msk.f32.vlgmr.msra.gmra.mrb[0].mxu0 %vm212_vm0, %v3069_v16 }
  0x61   : >> { %4032 = vmatpush3.bf16.msra.mxu0 %v4029_v2  ;;  %3808 = vmatmul.mubr.msk.f32.vlgmr.msra.gmra.mrb[0].mxu1 %vm212_vm0, %v3069_v16  ;;  %v4107_v2 = vpack.c.bf16 %v3155_v0, %v3154_v63  ;;  %v4127_v16 = vpack.c.bf16 %v3177_v15, %v3176_v14 }
  0x62   : >> { %4242 = vmatpush3.bf16.msra.mxu1 %v4043_v13  ;;  %4034 = vmatprep.subr.bf16.mxu0 %v4033_v6 }
  0x63   : >> { %4244 = vmatprep.subr.bf16.mxu1 %v4047_v17  ;;  %3597 = vmatprep.mubr.msk.f32.mxu0 %vm212_vm0, %v3081_v21 }
  0x64   : >> { %3822 = vmatprep.mubr.msk.f32.mxu1 %vm212_vm0, %v3081_v21 }
  0x65   : >> { %4036 = vmatpush3.bf16.msra.mxu0 %v4033_v6  ;;  %v3165_v6 = vld [vmem:[%s4545_s25 + $0x250] sm:$0xff] }
  0x66   : >> { %4246 = vmatpush3.bf16.msra.mxu1 %v4047_v17  ;;  %4039 = vmatprep.subr.msk.bf16.mxu0 %vm4566_vm3, %v4037_v10  ;;  %v4117_v9 = vpack.c.bf16 %v3166_v7, %v3165_v6 }
  0x67   : >> { %4249 = vmatprep.subr.msk.bf16.mxu1 %vm4566_vm3, %v4051_v22 }
  0x69   : >> { %4042 = vmatpush3.bf16.msk.msra.mxu0 %vm4566_vm3, %v4037_v10  ;;  %v3167_v10 = vld [vmem:[%s4545_s25 + $0x260] sm:$0xff] }
  0x6a   : >> { %4252 = vmatpush3.bf16.msk.msra.mxu1 %vm4566_vm3, %v4051_v22  ;;  %4044 = vmatprep.subr.bf16.mxu0 %v4043_v13 }
  0x6b   : >> { %4254 = vmatprep.subr.bf16.mxu1 %v4057_v25 }
  0x6c   : >> { %3598 = vmatmul.mubr.msk.f32.vlgmr.msra.gmra.mrb[0].mxu0 %vm212_vm0, %v3082_v28 }
  0x6d   : >> { %4046 = vmatpush3.bf16.msra.mxu0 %v4043_v13  ;;  %3823 = vmatmul.mubr.msk.f32.vlgmr.msra.gmra.mrb[0].mxu1 %vm212_vm0, %v3082_v28  ;;  %v4121_v13 = vpack.c.bf16 %v3168_v11, %v3167_v10  ;;  %v4141_v28 = vpack.c.bf16 %v3190_v27, %v3189_v26 }
  0x6e   : >> { %4256 = vmatpush3.bf16.msra.mxu1 %v4057_v25  ;;  %4048 = vmatprep.subr.bf16.mxu0 %v4047_v17 }
  0x6f   : >> { %4258 = vmatprep.subr.bf16.mxu1 %v4061_v29  ;;  %3612 = vmatprep.mubr.msk.f32.mxu0 %vm212_vm0, %v3094_v32 }
  0x70   : >> { %3837 = vmatprep.mubr.msk.f32.mxu1 %vm212_vm0, %v3094_v32 }
  0x71   : >> { %4050 = vmatpush3.bf16.msra.mxu0 %v4047_v17  ;;  %v3178_v17 = vld [vmem:[%s4545_s25 + $0x280] sm:$0xff] }
  0x72   : >> { %4260 = vmatpush3.bf16.msra.mxu1 %v4061_v29  ;;  %4053 = vmatprep.subr.msk.bf16.mxu0 %vm4566_vm3, %v4051_v22  ;;  %v4131_v21 = vpack.c.bf16 %v3179_v19, %v3178_v17 }
  0x73   : >> { %4263 = vmatprep.subr.msk.bf16.mxu1 %vm4566_vm3, %v4065_v33 }
  0x75   : >> { %4056 = vmatpush3.bf16.msk.msra.mxu0 %vm4566_vm3, %v4051_v22  ;;  %v3180_v22 = vld [vmem:[%s4545_s25 + $0x290] sm:$0xff] }
  0x76   : >> { %4266 = vmatpush3.bf16.msk.msra.mxu1 %vm4566_vm3, %v4065_v33  ;;  %4058 = vmatprep.subr.bf16.mxu0 %v4057_v25 }
  0x77   : >> { %4268 = vmatprep.subr.bf16.mxu1 %v4071_v36 }
  0x78   : >> { %3613 = vmatmul.mubr.msk.f32.vlgmr.msra.gmra.mrb[0].mxu0 %vm212_vm0, %v3095_v39 }
  0x79   : >> { %4060 = vmatpush3.bf16.msra.mxu0 %v4057_v25  ;;  %3838 = vmatmul.mubr.msk.f32.vlgmr.msra.gmra.mrb[0].mxu1 %vm212_vm0, %v3095_v39  ;;  %v4135_v25 = vpack.c.bf16 %v3181_v23, %v3180_v22  ;;  %v4351_v39 = vpack.c.bf16 %v3243_v38, %v3242_v37 }
  0x7a   : >> { %4270 = vmatpush3.bf16.msra.mxu1 %v4071_v36  ;;  %4062 = vmatprep.subr.bf16.mxu0 %v4061_v29 }
  0x7b   : >> { %4272 = vmatprep.subr.bf16.mxu1 %v4075_v40  ;;  %3627 = vmatprep.mubr.msk.f32.mxu0 %vm212_vm0, %v3107_v43 }
  0x7c   : >> { %3852 = vmatprep.mubr.msk.f32.mxu1 %vm212_vm0, %v3107_v43 }
  0x7d   : >> { %4064 = vmatpush3.bf16.msra.mxu0 %v4061_v29  ;;  %v3191_v29 = vld [vmem:[%s4545_s25 + $0x2b0] sm:$0xff] }
  0x7e   : >> { %4274 = vmatpush3.bf16.msra.mxu1 %v4075_v40  ;;  %4067 = vmatprep.subr.msk.bf16.mxu0 %vm4566_vm3, %v4065_v33  ;;  %v4145_v32 = vpack.c.bf16 %v3192_v30, %v3191_v29 }
  0x7f   : >> { %4277 = vmatprep.subr.msk.bf16.mxu1 %vm4566_vm3, %v4079_v44 }
  0x81   : >> { %4070 = vmatpush3.bf16.msk.msra.mxu0 %vm4566_vm3, %v4065_v33  ;;  %v3193_v33 = vld [vmem:[%s4545_s25 + $0x2c0] sm:$0xff] }
  0x82   : >> { %4280 = vmatpush3.bf16.msk.msra.mxu1 %vm4566_vm3, %v4079_v44  ;;  %4072 = vmatprep.subr.bf16.mxu0 %v4071_v36 }
  0x83   : >> { %4282 = vmatprep.subr.bf16.mxu1 %v4085_v47 }
  0x84   : >> { %3628 = vmatmul.mubr.msk.f32.vlgmr.msra.gmra.mrb[0].mxu0 %vm212_vm0, %v3108_v50 }
  0x85   : >> { %4074 = vmatpush3.bf16.msra.mxu0 %v4071_v36  ;;  %3853 = vmatmul.mubr.msk.f32.vlgmr.msra.gmra.mrb[0].mxu1 %vm212_vm0, %v3108_v50  ;;  %v4149_v36 = vpack.c.bf16 %v3194_v34, %v3193_v33 }
  0x86   : >> { %4284 = vmatpush3.bf16.msra.mxu1 %v4085_v47  ;;  %4076 = vmatprep.subr.bf16.mxu0 %v4075_v40 }
  0x87   : >> { %4286 = vmatprep.subr.bf16.mxu1 %v4089_v51  ;;  %3642 = vmatprep.mubr.msk.f32.mxu0 %vm212_vm0, %v3120_v54 }
  0x88   : >> { %3867 = vmatprep.mubr.msk.f32.mxu1 %vm212_vm0, %v3120_v54 }
  0x89   : >> { %4078 = vmatpush3.bf16.msra.mxu0 %v4075_v40  ;;  %v3244_v40 = vld [vmem:[%s4545_s25 + $0x2e0] sm:$0xff] }
  0x8a   : >> { %4288 = vmatpush3.bf16.msra.mxu1 %v4089_v51  ;;  %4081 = vmatprep.subr.msk.bf16.mxu0 %vm4566_vm3, %v4079_v44  ;;  %v4355_v43 = vpack.c.bf16 %v3245_v41, %v3244_v40 }
  0x8b   : >> { %4291 = vmatprep.subr.msk.bf16.mxu1 %vm4566_vm3, %v4093_v55 }
  0x8d   : >> { %4084 = vmatpush3.bf16.msk.msra.mxu0 %vm4566_vm3, %v4079_v44  ;;  %v3246_v44 = vld [vmem:[%s4545_s25 + $0x2f0] sm:$0xff] }
  0x8e   : >> { %4294 = vmatpush3.bf16.msk.msra.mxu1 %vm4566_vm3, %v4093_v55  ;;  %4086 = vmatprep.subr.bf16.mxu0 %v4085_v47 }
  0x8f   : >> { %4296 = vmatprep.subr.bf16.mxu1 %v4099_v58 }
  0x90   : >> { %3643 = vmatmul.mubr.msk.f32.vlgmr.msra.gmra.mrb[0].mxu0 %vm212_vm0, %v3121_v61 }
  0x91   : >> { %4088 = vmatpush3.bf16.msra.mxu0 %v4085_v47  ;;  %3868 = vmatmul.mubr.msk.f32.vlgmr.msra.gmra.mrb[0].mxu1 %vm212_vm0, %v3121_v61  ;;  %v4359_v47 = vpack.c.bf16 %v3247_v45, %v3246_v44 }
  0x92   : >> { %4298 = vmatpush3.bf16.msra.mxu1 %v4099_v58  ;;  %4090 = vmatprep.subr.bf16.mxu0 %v4089_v51 }
  0x93   : >> { %4300 = vmatprep.subr.bf16.mxu1 %v4103_v62  ;;  %3657 = vmatprep.mubr.msk.f32.mxu0 %vm212_vm0, %v3133_v1 }
  0x94   : >> { %3882 = vmatprep.mubr.msk.f32.mxu1 %vm212_vm0, %v3133_v1 }
  0x95   : >> { %4092 = vmatpush3.bf16.msra.mxu0 %v4089_v51 }
  0x96   : >> { %4302 = vmatpush3.bf16.msra.mxu1 %v4103_v62  ;;  %4095 = vmatprep.subr.msk.bf16.mxu0 %vm4566_vm3, %v4093_v55 }
  0x97   : >> { %4305 = vmatprep.subr.msk.bf16.mxu1 %vm4566_vm3, %v4107_v2 }
  0x99   : >> { %4098 = vmatpush3.bf16.msk.msra.mxu0 %vm4566_vm3, %v4093_v55 }
  0x9a   : >> { %4308 = vmatpush3.bf16.msk.msra.mxu1 %vm4566_vm3, %v4107_v2  ;;  %4100 = vmatprep.subr.bf16.mxu0 %v4099_v58 }
  0x9b   : >> { %4310 = vmatprep.subr.bf16.mxu1 %v4113_v5 }
  0x9c   : >> { %3658 = vmatmul.mubr.msk.f32.vlgmr.msra.gmra.mrb[0].mxu0 %vm212_vm0, %v3134_v8 }
  0x9d   : >> { %4102 = vmatpush3.bf16.msra.mxu0 %v4099_v58  ;;  %3883 = vmatmul.mubr.msk.f32.vlgmr.msra.gmra.mrb[0].mxu1 %vm212_vm0, %v3134_v8 }
  0x9e   : >> { %4312 = vmatpush3.bf16.msra.mxu1 %v4113_v5  ;;  %4104 = vmatprep.subr.bf16.mxu0 %v4103_v62 }
  0x9f   : >> { %4314 = vmatprep.subr.bf16.mxu1 %v4117_v9  ;;  %3672 = vmatprep.mubr.msk.f32.mxu0 %vm212_vm0, %v3146_v12 }
  0xa0   : >> { %3897 = vmatprep.mubr.msk.f32.mxu1 %vm212_vm0, %v3146_v12 }
  0xa1   : >> { %4106 = vmatpush3.bf16.msra.mxu0 %v4103_v62 }
  0xa2   : >> { %4316 = vmatpush3.bf16.msra.mxu1 %v4117_v9  ;;  %4109 = vmatprep.subr.msk.bf16.mxu0 %vm4566_vm3, %v4107_v2 }
  0xa3   : >> { %4319 = vmatprep.subr.msk.bf16.mxu1 %vm4566_vm3, %v4121_v13 }
  0xa5   : >> { %4112 = vmatpush3.bf16.msk.msra.mxu0 %vm4566_vm3, %v4107_v2 }
  0xa6   : >> { %4322 = vmatpush3.bf16.msk.msra.mxu1 %vm4566_vm3, %v4121_v13  ;;  %4114 = vmatprep.subr.bf16.mxu0 %v4113_v5 }
  0xa7   : >> { %4324 = vmatprep.subr.bf16.mxu1 %v4127_v16 }
  0xa8   : >> { %3673 = vmatmul.mubr.msk.f32.vlgmr.msra.gmra.mrb[0].mxu0 %vm212_vm0, %v3147_v20 }
  0xa9   : >> { %4116 = vmatpush3.bf16.msra.mxu0 %v4113_v5  ;;  %3898 = vmatmul.mubr.msk.f32.vlgmr.msra.gmra.mrb[0].mxu1 %vm212_vm0, %v3147_v20 }
  0xaa   : >> { %4326 = vmatpush3.bf16.msra.mxu1 %v4127_v16  ;;  %4118 = vmatprep.subr.bf16.mxu0 %v4117_v9 }
  0xab   : >> { %4328 = vmatprep.subr.bf16.mxu1 %v4131_v21  ;;  %3687 = vmatprep.mubr.msk.f32.mxu0 %vm212_vm0, %v3159_v24 }
  0xac   : >> { %3912 = vmatprep.mubr.msk.f32.mxu1 %vm212_vm0, %v3159_v24 }
  0xad   : >> { %4120 = vmatpush3.bf16.msra.mxu0 %v4117_v9 }
  0xae   : >> { %4330 = vmatpush3.bf16.msra.mxu1 %v4131_v21  ;;  %4123 = vmatprep.subr.msk.bf16.mxu0 %vm4566_vm3, %v4121_v13 }
  0xaf   : >> { %4333 = vmatprep.subr.msk.bf16.mxu1 %vm4566_vm3, %v4135_v25 }
  0xb1   : >> { %4126 = vmatpush3.bf16.msk.msra.mxu0 %vm4566_vm3, %v4121_v13 }
  0xb2   : >> { %4336 = vmatpush3.bf16.msk.msra.mxu1 %vm4566_vm3, %v4135_v25  ;;  %4128 = vmatprep.subr.bf16.mxu0 %v4127_v16 }
  0xb3   : >> { %4338 = vmatprep.subr.bf16.mxu1 %v4141_v28 }
  0xb4   : >> { %3688 = vmatmul.mubr.msk.f32.vlgmr.msra.gmra.mrb[0].mxu0 %vm212_vm0, %v3160_v31 }
  0xb5   : >> { %4130 = vmatpush3.bf16.msra.mxu0 %v4127_v16  ;;  %3913 = vmatmul.mubr.msk.f32.vlgmr.msra.gmra.mrb[0].mxu1 %vm212_vm0, %v3160_v31 }
  0xb6   : >> { %4340 = vmatpush3.bf16.msra.mxu1 %v4141_v28  ;;  %4132 = vmatprep.subr.bf16.mxu0 %v4131_v21 }
  0xb7   : >> { %4342 = vmatprep.subr.bf16.mxu1 %v4145_v32  ;;  %3702 = vmatprep.mubr.msk.f32.mxu0 %vm212_vm0, %v3172_v35 }
  0xb8   : >> { %3927 = vmatprep.mubr.msk.f32.mxu1 %vm212_vm0, %v3172_v35 }
  0xb9   : >> { %4134 = vmatpush3.bf16.msra.mxu0 %v4131_v21 }
  0xba   : >> { %4344 = vmatpush3.bf16.msra.mxu1 %v4145_v32  ;;  %4137 = vmatprep.subr.msk.bf16.mxu0 %vm4566_vm3, %v4135_v25 }
  0xbb   : >> { %4347 = vmatprep.subr.msk.bf16.mxu1 %vm4566_vm3, %v4149_v36 }
  0xbd   : >> { %4140 = vmatpush3.bf16.msk.msra.mxu0 %vm4566_vm3, %v4135_v25 }
  0xbe   : >> { %4350 = vmatpush3.bf16.msk.msra.mxu1 %vm4566_vm3, %v4149_v36  ;;  %4142 = vmatprep.subr.bf16.mxu0 %v4141_v28 }
  0xbf   : >> { %4352 = vmatprep.subr.bf16.mxu1 %v4351_v39 }
  0xc0   : >> { %3703 = vmatmul.mubr.msk.f32.vlgmr.msra.gmra.mrb[0].mxu0 %vm212_vm0, %v3173_v42 }
  0xc1   : >> { %4144 = vmatpush3.bf16.msra.mxu0 %v4141_v28  ;;  %3928 = vmatmul.mubr.msk.f32.vlgmr.msra.gmra.mrb[0].mxu1 %vm212_vm0, %v3173_v42 }
  0xc2   : >> { %4354 = vmatpush3.bf16.msra.mxu1 %v4351_v39  ;;  %4146 = vmatprep.subr.bf16.mxu0 %v4145_v32 }
  0xc3   : >> { %4356 = vmatprep.subr.bf16.mxu1 %v4355_v43  ;;  %3717 = vmatprep.mubr.msk.f32.mxu0 %vm212_vm0, %v3185_v46 }
  0xc4   : >> { %3942 = vmatprep.mubr.msk.f32.mxu1 %vm212_vm0, %v3185_v46 }
  0xc5   : >> { %4148 = vmatpush3.bf16.msra.mxu0 %v4145_v32 }
  0xc6   : >> { %4358 = vmatpush3.bf16.msra.mxu1 %v4355_v43  ;;  %4151 = vmatprep.subr.msk.bf16.mxu0 %vm4566_vm3, %v4149_v36 }
  0xc7   : >> { %4361 = vmatprep.subr.msk.bf16.mxu1 %vm4566_vm3, %v4359_v47 }
  0xc9   : >> { %4154 = vmatpush3.bf16.msk.msra.mxu0 %vm4566_vm3, %v4149_v36 }
  0xca   : >> { %4364 = vmatpush3.bf16.msk.msra.mxu1 %vm4566_vm3, %v4359_v47 }
  0xcc   : >> { %3718 = vmatmul.mubr.msk.f32.vlgmr.msra.gmra.mrb[0].mxu0 %vm212_vm0, %v3186_v48 }
  0xcd   : >> { %3943 = vmatmul.mubr.msk.f32.vlgmr.msra.gmra.mrb[0].mxu1 %vm212_vm0, %v3186_v48 }
 0x19f   : >> { %v3719_v49 = vpop.f32.mrb[0].mxu0 }
 0x1a0   : >> { %v3944_v50 = vpop.f32.mrb[0].mxu1  ;;  %v1645_v51 = vpop.f32.mrb[1].mxu0 }
 0x1a1   : >> { %v2820_v52 = vmax.f32 %v3719_v49, %v3944_v50  ;;  %v2808_v53 = vpop.f32.mrb[1].mxu1 }
 0x1a2   : >> { %v2819_v54 = vmax.f32 %v1645_v51, %v2808_v53 }
 0x1a4   : >> { %2823 = vrot.lane.b32.xlu0 %v2819_v54, %s4489_s16 }
 0x1a8   : >> { %2825 = vrot.lane.b32.xlu0 %v2820_v52, %s4489_s16 }
 0x216   : >> { %v2824_v55 = vpop.permute.xlu0 %2823 }
 0x217   : >> { %v2829_v56 = vmax.f32 %v2819_v54, %v2824_v55 }
 0x219   : >> { %v2831_v18 = vmax.f32 %v2829_v56, 0.0  ;;  %187 = sbr.rel (!%p185_p5) target bundleno = 18 (0x12), region = 96 }
 0x21a   : >> { %v2826_v57 = vpop.permute.xlu0 %2825 }
 0x21b   : >> { %2836 = vst.msk [vmem:[%s2834_s19] sm:$0xff] %vm2835_vm4, %v2831_v18  ;;  %v2830_v58 = vmax.f32 %v2820_v52, %v2826_v57 }
 0x21d   : >> { %v2832_v59 = vmax.f32 %v2830_v58, 0.0 }
 0x21f   : >> { %2837 = vst.msk [vmem:[%s2834_s19 + $0x8] sm:$0xff] %vm2835_vm4, %v2832_v59 }
 0x220 PF: > { %s12_s11 = sadd.s32 1, %s4482_s11   ;;  %s4949_s9 = smov %s4478_s10 }
 0x221   : > { %p9_p6 = scmp.ge.s32.totalorder %s12_s11, 4   ;;  %s4950_s10 = smov %s4952_s12 }
 0x223   :  { %11 = sbr.rel (!%p9_p6) target bundleno = 2 (0x2), region = 107 }

</bundles_post_ra>
